<compile_context>
chip_gen: v6e
topology: v6e:2x2x1
jax: 0.10.0
libtpu: 0.0.40
codegen_flags: <defaults>
</compile_context>

<pallas_src>
import jax
import jax.numpy as jnp
from jax import lax
from jax.experimental import pallas as pl
from jax.experimental.pallas import tpu as pltpu


def _round_up(x, m):
    return ((x + m - 1) // m) * m


# ----------------------------------------------------------------------------
# Pallas kernel: single invocation, fully unrolled recurrence.
# ----------------------------------------------------------------------------
def _char_decoder_kernel(
    ids_ref,      # SMEM (L*B,)   flattened token ids (scalar prefetch)
    xw_tab_ref,   # (Vt, 4H) f32  per-token input-gate table (bias folded, i/f/o cols *0.5)
    w_hh_ref,     # (H, 4H) bf16  hidden->gates weights (transposed, i/f/o cols *0.5)
    w_proj_ref,   # (H, Vp) bf16  output projection weights (transposed, V padded)
    b_proj_ref,   # (1, Vp) f32   output projection bias (V padded)
    h0_ref,       # (Bp, H) f32   initial hidden state
    c0_ref,       # (Bp, H) f32   initial cell state
    scores_ref,   # (L*Bp, Vp) f32  lane-dense scores output
    h_out_ref,    # (Bp, H) f32   final hidden state
    c_out_ref,    # (Bp, H) f32   final cell state
    x_sc,         # VMEM (Bp, 4H) f32  current step's gathered input rows
    h_all_sc,     # VMEM (L*Bp, H) f32 per-step hidden states
):
    Bp, H = h0_ref.shape
    L = h_all_sc.shape[0] // Bp
    B = ids_ref.shape[0] // L

    w_hh = w_hh_ref[...]          # (H, 4H) bf16, loaded once
    h = h0_ref[...]               # (Bp, H) f32
    c = c0_ref[...]

    # Padded batch rows (b >= B) stay exactly zero for all steps: the bias is
    # only present in the gathered table rows, never in padded rows.
    x_sc[...] = jnp.zeros_like(x_sc)

    # Fully unrolled at trace time (L, B are static) -> all slices below are
    # static except the table row offset; one small MXU matmul per step on the
    # serial path.
    for t in range(L):
        # Gather this step's rows (no dependence on h -> off the critical path).
        for b in range(B):
            tok = ids_ref[t * B + b]
            x_sc[b:b + 1, :] = xw_tab_ref[pl.ds(tok, 1), :]

        gates = x_sc[...] + jnp.dot(
            h.astype(jnp.bfloat16), w_hh, preferred_element_type=jnp.float32)

        # One full-vreg EUP tanh; sigmoid(z) = 0.5*tanh(0.5*z) + 0.5 with the
        # 0.5 pre-scale already folded into the i/f/o columns of the operands.
        t_all = jnp.tanh(gates)                    # (Bp, 4H)
        i_g = 0.5 * t_all[:, 0 * H:1 * H] + 0.5
        f_g = 0.5 * t_all[:, 1 * H:2 * H] + 0.5
        g_g = t_all[:, 2 * H:3 * H]
        o_g = 0.5 * t_all[:, 3 * H:4 * H] + 0.5

        c = f_g * c + i_g * g_g
        h = o_g * jnp.tanh(c)

        h_all_sc[t * Bp:(t + 1) * Bp, :] = h       # static, sublane-aligned store

    # Final states written once (not per-step).
    h_out_ref[...] = h
    c_out_ref[...] = c

    # One big, lane-dense bf16 projection for all timesteps at once (f32 acc).
    scores_ref[...] = (
        jnp.dot(h_all_sc[...].astype(jnp.bfloat16), w_proj_ref[...],
                preferred_element_type=jnp.float32)
        + b_proj_ref[...]
    )


# ----------------------------------------------------------------------------
# Wrapper: weight prep + single pallas_call.
# ----------------------------------------------------------------------------
@jax.jit
def char_decoder_forward(input_ids, params, h0, c0):
    """input_ids: (L, B) int32; h0, c0: (1, B, H).  Returns (scores, (hN, cN))."""
    L, B = input_ids.shape
    emb = params["emb"]            # (V, E), padding row already zeroed
    w_ih = params["w_ih"]          # (E, 4H)
    w_hh = params["w_hh"]          # (H, 4H)
    b = params["b"]                # (1, 4H)  = b_ih + b_hh
    w_proj = params["w_proj"]      # (H, V)
    b_proj = params["b_proj"]      # (1, V)

    V = emb.shape[0]
    H = w_hh.shape[0]
    Bp = _round_up(B, 8)           # sublane-dense batch
    Vt = _round_up(V, 8)           # sublane-aligned gather table
    Vp = _round_up(V, 128)         # lane-dense scores

    # 0.5 pre-scale for the sigmoid-as-tanh trick on the i, f, o gate columns
    # (gate order matches PyTorch nn.LSTM: [i, f, g, o]).
    gate_scale = jnp.concatenate([
        jnp.full((2 * H,), 0.5, jnp.float32),     # i, f
        jnp.ones((H,), jnp.float32),              # g
        jnp.full((H,), 0.5, jnp.float32),         # o
    ])[None, :]                                    # (1, 4H)

    # Input->gates table for the whole (tiny) vocab; bias folded in.  Gathered
    # per token inside the kernel, so nothing per-timestep remains here.
    xw_table = (jnp.dot(emb, w_ih, preferred_element_type=jnp.float32,
                        precision=lax.Precision.HIGHEST) + b) * gate_scale
    xw_table = jnp.pad(xw_table, ((0, Vt - V), (0, 0)))                 # (Vt, 4H)

    w_hh_s = (w_hh * gate_scale).astype(jnp.bfloat16)                   # (H, 4H)
    w_proj_p = jnp.pad(w_proj, ((0, 0), (0, Vp - V))).astype(jnp.bfloat16)
    b_proj_p = jnp.pad(b_proj, ((0, 0), (0, Vp - V)))                   # (1, Vp)

    h0_p = jnp.pad(h0[0], ((0, Bp - B), (0, 0)))                        # (Bp, H)
    c0_p = jnp.pad(c0[0], ((0, Bp - B), (0, 0)))

    ids_flat = input_ids.reshape(L * B).astype(jnp.int32)

    grid_spec = pltpu.PrefetchScalarGridSpec(
        num_scalar_prefetch=1,
        grid=(1,),                                       # single invocation
        in_specs=[
            pl.BlockSpec((Vt, 4 * H), lambda i, ids: (0, 0)),
            pl.BlockSpec((H, 4 * H), lambda i, ids: (0, 0)),
            pl.BlockSpec((H, Vp), lambda i, ids: (0, 0)),
            pl.BlockSpec((1, Vp), lambda i, ids: (0, 0)),
            pl.BlockSpec((Bp, H), lambda i, ids: (0, 0)),
            pl.BlockSpec((Bp, H), lambda i, ids: (0, 0)),
        ],
        out_specs=[
            pl.BlockSpec((L * Bp, Vp), lambda i, ids: (0, 0)),
            pl.BlockSpec((Bp, H), lambda i, ids: (0, 0)),
            pl.BlockSpec((Bp, H), lambda i, ids: (0, 0)),
        ],
        scratch_shapes=[
            pltpu.VMEM((Bp, 4 * H), jnp.float32),
            pltpu.VMEM((L * Bp, H), jnp.float32),
        ],
    )

    scores_p, h_n, c_n = pl.pallas_call(
        _char_decoder_kernel,
        out_shape=(
            jax.ShapeDtypeStruct((L * Bp, Vp), jnp.float32),
            jax.ShapeDtypeStruct((Bp, H), jnp.float32),
            jax.ShapeDtypeStruct((Bp, H), jnp.float32),
        ),
        grid_spec=grid_spec,
        compiler_params=pltpu.CompilerParams(
            dimension_semantics=("arbitrary",),
        ),
    )(ids_flat, xw_table, w_hh_s, w_proj_p, b_proj_p, h0_p, c0_p)

    scores = scores_p.reshape(L, Bp, Vp)[:, :B, :V]
    return scores, (h_n[None, :B, :], c_n[None, :B, :])


# ----------------------------------------------------------------------------
# Pure-JAX reference (matches PyTorch nn.Embedding + nn.LSTM + nn.Linear math).
# ----------------------------------------------------------------------------
def char_decoder_reference(input_ids, params, h0, c0):
    emb = params["emb"]
    w_ih, w_hh, b = params["w_ih"], params["w_hh"], params["b"]
    w_proj, b_proj = params["w_proj"], params["b_proj"]
    H = w_hh.shape[0]

    x = jnp.take(emb, input_ids, axis=0)  # (L, B, E)

    def step(carry, x_t):
        h, c = carry
        gates = x_t @ w_ih + h @ w_hh + b[0]
        i_g = jax.nn.sigmoid(gates[:, 0 * H:1 * H])
        f_g = jax.nn.sigmoid(gates[:, 1 * H:2 * H])
        g_g = jnp.tanh(gates[:, 2 * H:3 * H])
        o_g = jax.nn.sigmoid(gates[:, 3 * H:4 * H])
        c_new = f_g * c + i_g * g_g
        h_new = o_g * jnp.tanh(c_new)
        return (h_new, c_new), h_new

    (h_n, c_n), hs = lax.scan(step, (h0[0], c0[0]), x)
    scores = hs @ w_proj + b_proj[0]
    return scores, (h_n[None], c_n[None])


# ----------------------------------------------------------------------------
# Deterministic parameter construction (mirrors CharDecoder.__init__ shapes).
# ----------------------------------------------------------------------------
def make_params(key, vocab_size, char_emb_size, hidden_size, padding_idx):
    ks = jax.random.split(key, 6)
    scale = 0.1
    emb = scale * jax.random.normal(ks[0], (vocab_size, char_emb_size), jnp.float32)
    emb = emb.at[padding_idx].set(0.0)  # nn.Embedding padding_idx row is zero
    # PyTorch LSTM stores weight_ih_l0 as (4H, E); we store the transpose.
    w_ih = scale * jax.random.normal(ks[1], (char_emb_size, 4 * hidden_size), jnp.float32)
    w_hh = scale * jax.random.normal(ks[2], (hidden_size, 4 * hidden_size), jnp.float32)
    b_ih = scale * jax.random.normal(ks[3], (4 * hidden_size,), jnp.float32)
    b_hh = scale * jax.random.normal(ks[4], (4 * hidden_size,), jnp.float32)
    # nn.Linear(hidden, vocab): weight (V, H); we store transpose (H, V).
    w_proj = scale * jax.random.normal(ks[5], (hidden_size, vocab_size), jnp.float32)
    b_proj = jnp.zeros((1, vocab_size), jnp.float32)
    return {
        "emb": emb,
        "w_ih": w_ih,
        "w_hh": w_hh,
        "b": (b_ih + b_hh)[None, :],
        "w_proj": w_proj,
        "b_proj": b_proj,
    }


if __name__ == "__main__":
    # Small shapes consistent with CharDecoder: char vocab ~30, emb 50, hidden 32.
    LENGTH = 8
    BATCH = 4
    HIDDEN = 32
    CHAR_EMB = 50
    VOCAB = 30
    PAD_IDX = 0

    key = jax.random.PRNGKey(0)
    k_par, k_in, k_h, k_c = jax.random.split(key, 4)

    params = make_params(k_par, VOCAB, CHAR_EMB, HIDDEN, PAD_IDX)
    input_ids = jax.random.randint(k_in, (LENGTH, BATCH), 0, VOCAB, dtype=jnp.int32)
    h0 = 0.1 * jax.random.normal(k_h, (1, BATCH, HIDDEN), jnp.float32)
    c0 = 0.1 * jax.random.normal(k_c, (1, BATCH, HIDDEN), jnp.float32)

    scores, (h_n, c_n) = char_decoder_forward(input_ids, params, h0, c0)
    jax.block_until_ready((scores, h_n, c_n))

    # Sanity check against the pure-JAX reference (bf16 MXU inputs in the
    # kernel accumulate small rounding error across L steps; well within 1e-2
    # at these shapes).
    ref_scores, (ref_h, ref_c) = char_decoder_reference(input_ids, params, h0, c0)
    assert scores.shape == (LENGTH, BATCH, VOCAB)
    assert h_n.shape == (1, BATCH, HIDDEN) and c_n.shape == (1, BATCH, HIDDEN)
    assert jnp.allclose(scores, ref_scores, atol=1e-2, rtol=1e-2)
    assert jnp.allclose(h_n, ref_h, atol=1e-2, rtol=1e-2)
    assert jnp.allclose(c_n, ref_c, atol=1e-2, rtol=1e-2)

    print("KERNEL_OK")
</pallas_src>

<mosaic_0001>
module attributes {stable_mosaic.version = 11 : i64} {
  func.func @_char_decoder_kernel(%arg0: i32, %arg1: memref<32xi32, #tpu.memory_space<smem>>, %arg2: memref<32x128xf32, #tpu.memory_space<vmem>>, %arg3: memref<32x128xbf16, #tpu.memory_space<vmem>>, %arg4: memref<32x128xbf16, #tpu.memory_space<vmem>>, %arg5: memref<1x128xf32, #tpu.memory_space<vmem>>, %arg6: memref<8x32xf32, #tpu.memory_space<vmem>>, %arg7: memref<8x32xf32, #tpu.memory_space<vmem>>, %arg8: memref<64x128xf32, #tpu.memory_space<vmem>>, %arg9: memref<8x32xf32, #tpu.memory_space<vmem>>, %arg10: memref<8x32xf32, #tpu.memory_space<vmem>>, %arg11: memref<8x128xf32, #tpu.memory_space<vmem>>, %arg12: memref<64x32xf32, #tpu.memory_space<vmem>>) attributes {dimension_semantics = [#tpu.dimension_semantics<arbitrary>], iteration_bounds = array<i64: 1>, scalar_prefetch = 1 : i64, scratch_operands = 2 : i64, tpu.core_type = #tpu.core_type<tc>, window_params = [{pipeline_mode = #tpu.pipeline_mode<synchronous>, transform_indices = @transform_0, window_bounds = array<i64: 32, 128>}, {pipeline_mode = #tpu.pipeline_mode<synchronous>, transform_indices = @transform_1, window_bounds = array<i64: 32, 128>}, {pipeline_mode = #tpu.pipeline_mode<synchronous>, transform_indices = @transform_2, window_bounds = array<i64: 32, 128>}, {pipeline_mode = #tpu.pipeline_mode<synchronous>, transform_indices = @transform_3, window_bounds = array<i64: 1, 128>}, {pipeline_mode = #tpu.pipeline_mode<synchronous>, transform_indices = @transform_4, window_bounds = array<i64: 8, 32>}, {pipeline_mode = #tpu.pipeline_mode<synchronous>, transform_indices = @transform_5, window_bounds = array<i64: 8, 32>}, {pipeline_mode = #tpu.pipeline_mode<synchronous>, transform_indices = @transform_6, window_bounds = array<i64: 64, 128>}, {pipeline_mode = #tpu.pipeline_mode<synchronous>, transform_indices = @transform_7, window_bounds = array<i64: 8, 32>}, {pipeline_mode = #tpu.pipeline_mode<synchronous>, transform_indices = @transform_8, window_bounds = array<i64: 8, 32>}]} {
    %c0 = arith.constant 0 : index
    %c0_0 = arith.constant 0 : index
    %0 = vector.load %arg3[%c0, %c0_0] : memref<32x128xbf16, #tpu.memory_space<vmem>>, vector<32x128xbf16>
    %c0_1 = arith.constant 0 : index
    %c0_2 = arith.constant 0 : index
    %1 = vector.load %arg6[%c0_1, %c0_2] : memref<8x32xf32, #tpu.memory_space<vmem>>, vector<8x32xf32>
    %c0_3 = arith.constant 0 : index
    %c0_4 = arith.constant 0 : index
    %2 = vector.load %arg7[%c0_3, %c0_4] : memref<8x32xf32, #tpu.memory_space<vmem>>, vector<8x32xf32>
    %cst = arith.constant 0.000000e+00 : f32
    %3 = vector.broadcast %cst : f32 to vector<8x128xf32>
    %c0_5 = arith.constant 0 : index
    %c0_6 = arith.constant 0 : index
    %4 = vector.load %arg11[%c0_5, %c0_6] : memref<8x128xf32, #tpu.memory_space<vmem>>, vector<8x128xf32>
    tpu.vector_store %arg11[%c0_5, %c0_6], %3 {strides = array<i32>} : memref<8x128xf32, #tpu.memory_space<vmem>>, vector<8x128xf32>,
    %c0_7 = arith.constant 0 : index
    %5 = memref.load %arg1[%c0_7] : memref<32xi32, #tpu.memory_space<smem>>
    %6 = arith.index_cast %5 : i32 to index
    %c0_8 = arith.constant 0 : index
    %7 = vector.load %arg2[%6, %c0_8] : memref<32x128xf32, #tpu.memory_space<vmem>>, vector<1x128xf32>
    %c0_9 = arith.constant 0 : index
    %c0_10 = arith.constant 0 : index
    %8 = vector.load %arg11[%c0_9, %c0_10] : memref<8x128xf32, #tpu.memory_space<vmem>>, vector<1x128xf32>
    tpu.vector_store %arg11[%c0_9, %c0_10], %7 {strides = array<i32>} : memref<8x128xf32, #tpu.memory_space<vmem>>, vector<1x128xf32>,
    %c1 = arith.constant 1 : index
    %9 = memref.load %arg1[%c1] : memref<32xi32, #tpu.memory_space<smem>>
    %10 = arith.index_cast %9 : i32 to index
    %c0_11 = arith.constant 0 : index
    %11 = vector.load %arg2[%10, %c0_11] : memref<32x128xf32, #tpu.memory_space<vmem>>, vector<1x128xf32>
    %c1_12 = arith.constant 1 : index
    %c0_13 = arith.constant 0 : index
    %12 = vector.load %arg11[%c1_12, %c0_13] : memref<8x128xf32, #tpu.memory_space<vmem>>, vector<1x128xf32>
    tpu.vector_store %arg11[%c1_12, %c0_13], %11 {strides = array<i32>} : memref<8x128xf32, #tpu.memory_space<vmem>>, vector<1x128xf32>,
    %c2 = arith.constant 2 : index
    %13 = memref.load %arg1[%c2] : memref<32xi32, #tpu.memory_space<smem>>
    %14 = arith.index_cast %13 : i32 to index
    %c0_14 = arith.constant 0 : index
    %15 = vector.load %arg2[%14, %c0_14] : memref<32x128xf32, #tpu.memory_space<vmem>>, vector<1x128xf32>
    %c2_15 = arith.constant 2 : index
    %c0_16 = arith.constant 0 : index
    %16 = vector.load %arg11[%c2_15, %c0_16] : memref<8x128xf32, #tpu.memory_space<vmem>>, vector<1x128xf32>
    tpu.vector_store %arg11[%c2_15, %c0_16], %15 {strides = array<i32>} : memref<8x128xf32, #tpu.memory_space<vmem>>, vector<1x128xf32>,
    %c3 = arith.constant 3 : index
    %17 = memref.load %arg1[%c3] : memref<32xi32, #tpu.memory_space<smem>>
    %18 = arith.index_cast %17 : i32 to index
    %c0_17 = arith.constant 0 : index
    %19 = vector.load %arg2[%18, %c0_17] : memref<32x128xf32, #tpu.memory_space<vmem>>, vector<1x128xf32>
    %c3_18 = arith.constant 3 : index
    %c0_19 = arith.constant 0 : index
    %20 = vector.load %arg11[%c3_18, %c0_19] : memref<8x128xf32, #tpu.memory_space<vmem>>, vector<1x128xf32>
    tpu.vector_store %arg11[%c3_18, %c0_19], %19 {strides = array<i32>} : memref<8x128xf32, #tpu.memory_space<vmem>>, vector<1x128xf32>,
    %c0_20 = arith.constant 0 : index
    %c0_21 = arith.constant 0 : index
    %21 = vector.load %arg11[%c0_20, %c0_21] : memref<8x128xf32, #tpu.memory_space<vmem>>, vector<8x128xf32>
    %22 = arith.truncf %1 : vector<8x32xf32> to vector<8x32xbf16>
    %cst_22 = arith.constant dense<0.000000e+00> : vector<8x128xf32>
    %23 = tpu.matmul %22, %0, %cst_22 {dimension_numbers = #tpu.dot_dimension_numbers<[1], [0], [0], [1], [0, 0, 1, 1], [], []>} : vector<8x32xbf16>, vector<32x128xbf16>, vector<8x128xf32> -> vector<8x128xf32>
    %24 = arith.addf %21, %23 : vector<8x128xf32>
    %25 = math.tanh %24 : vector<8x128xf32>
    %26 = vector.extract_strided_slice %25 {offsets = [0, 0], sizes = [8, 32], strides = [1, 1]} : vector<8x128xf32> to vector<8x32xf32>
    %cst_23 = arith.constant 5.000000e-01 : f32
    %27 = vector.broadcast %cst_23 : f32 to vector<8x32xf32>
    %28 = arith.mulf %27, %26 : vector<8x32xf32>
    %cst_24 = arith.constant 5.000000e-01 : f32
    %29 = vector.broadcast %cst_24 : f32 to vector<8x32xf32>
    %30 = arith.addf %28, %29 : vector<8x32xf32>
    %31 = vector.extract_strided_slice %25 {offsets = [0, 32], sizes = [8, 32], strides = [1, 1]} : vector<8x128xf32> to vector<8x32xf32>
    %cst_25 = arith.constant 5.000000e-01 : f32
    %32 = vector.broadcast %cst_25 : f32 to vector<8x32xf32>
    %33 = arith.mulf %32, %31 : vector<8x32xf32>
    %cst_26 = arith.constant 5.000000e-01 : f32
    %34 = vector.broadcast %cst_26 : f32 to vector<8x32xf32>
    %35 = arith.addf %33, %34 : vector<8x32xf32>
    %36 = vector.extract_strided_slice %25 {offsets = [0, 64], sizes = [8, 32], strides = [1, 1]} : vector<8x128xf32> to vector<8x32xf32>
    %37 = vector.extract_strided_slice %25 {offsets = [0, 96], sizes = [8, 32], strides = [1, 1]} : vector<8x128xf32> to vector<8x32xf32>
    %cst_27 = arith.constant 5.000000e-01 : f32
    %38 = vector.broadcast %cst_27 : f32 to vector<8x32xf32>
    %39 = arith.mulf %38, %37 : vector<8x32xf32>
    %cst_28 = arith.constant 5.000000e-01 : f32
    %40 = vector.broadcast %cst_28 : f32 to vector<8x32xf32>
    %41 = arith.addf %39, %40 : vector<8x32xf32>
    %42 = arith.mulf %35, %2 : vector<8x32xf32>
    %43 = arith.mulf %30, %36 : vector<8x32xf32>
    %44 = arith.addf %42, %43 : vector<8x32xf32>
    %45 = math.tanh %44 : vector<8x32xf32>
    %46 = arith.mulf %41, %45 : vector<8x32xf32>
    %c0_29 = arith.constant 0 : index
    %c0_30 = arith.constant 0 : index
    %47 = vector.load %arg12[%c0_29, %c0_30] : memref<64x32xf32, #tpu.memory_space<vmem>>, vector<8x32xf32>
    tpu.vector_store %arg12[%c0_29, %c0_30], %46 {strides = array<i32>} : memref<64x32xf32, #tpu.memory_space<vmem>>, vector<8x32xf32>,
    %c4 = arith.constant 4 : index
    %48 = memref.load %arg1[%c4] : memref<32xi32, #tpu.memory_space<smem>>
    %49 = arith.index_cast %48 : i32 to index
    %c0_31 = arith.constant 0 : index
    %50 = vector.load %arg2[%49, %c0_31] : memref<32x128xf32, #tpu.memory_space<vmem>>, vector<1x128xf32>
    %c0_32 = arith.constant 0 : index
    %c0_33 = arith.constant 0 : index
    %51 = vector.load %arg11[%c0_32, %c0_33] : memref<8x128xf32, #tpu.memory_space<vmem>>, vector<1x128xf32>
    tpu.vector_store %arg11[%c0_32, %c0_33], %50 {strides = array<i32>} : memref<8x128xf32, #tpu.memory_space<vmem>>, vector<1x128xf32>,
    %c5 = arith.constant 5 : index
    %52 = memref.load %arg1[%c5] : memref<32xi32, #tpu.memory_space<smem>>
    %53 = arith.index_cast %52 : i32 to index
    %c0_34 = arith.constant 0 : index
    %54 = vector.load %arg2[%53, %c0_34] : memref<32x128xf32, #tpu.memory_space<vmem>>, vector<1x128xf32>
    %c1_35 = arith.constant 1 : index
    %c0_36 = arith.constant 0 : index
    %55 = vector.load %arg11[%c1_35, %c0_36] : memref<8x128xf32, #tpu.memory_space<vmem>>, vector<1x128xf32>
    tpu.vector_store %arg11[%c1_35, %c0_36], %54 {strides = array<i32>} : memref<8x128xf32, #tpu.memory_space<vmem>>, vector<1x128xf32>,
    %c6 = arith.constant 6 : index
    %56 = memref.load %arg1[%c6] : memref<32xi32, #tpu.memory_space<smem>>
    %57 = arith.index_cast %56 : i32 to index
    %c0_37 = arith.constant 0 : index
    %58 = vector.load %arg2[%57, %c0_37] : memref<32x128xf32, #tpu.memory_space<vmem>>, vector<1x128xf32>
    %c2_38 = arith.constant 2 : index
    %c0_39 = arith.constant 0 : index
    %59 = vector.load %arg11[%c2_38, %c0_39] : memref<8x128xf32, #tpu.memory_space<vmem>>, vector<1x128xf32>
    tpu.vector_store %arg11[%c2_38, %c0_39], %58 {strides = array<i32>} : memref<8x128xf32, #tpu.memory_space<vmem>>, vector<1x128xf32>,
    %c7 = arith.constant 7 : index
    %60 = memref.load %arg1[%c7] : memref<32xi32, #tpu.memory_space<smem>>
    %61 = arith.index_cast %60 : i32 to index
    %c0_40 = arith.constant 0 : index
    %62 = vector.load %arg2[%61, %c0_40] : memref<32x128xf32, #tpu.memory_space<vmem>>, vector<1x128xf32>
    %c3_41 = arith.constant 3 : index
    %c0_42 = arith.constant 0 : index
    %63 = vector.load %arg11[%c3_41, %c0_42] : memref<8x128xf32, #tpu.memory_space<vmem>>, vector<1x128xf32>
    tpu.vector_store %arg11[%c3_41, %c0_42], %62 {strides = array<i32>} : memref<8x128xf32, #tpu.memory_space<vmem>>, vector<1x128xf32>,
    %c0_43 = arith.constant 0 : index
    %c0_44 = arith.constant 0 : index
    %64 = vector.load %arg11[%c0_43, %c0_44] : memref<8x128xf32, #tpu.memory_space<vmem>>, vector<8x128xf32>
    %65 = arith.truncf %46 : vector<8x32xf32> to vector<8x32xbf16>
    %cst_45 = arith.constant dense<0.000000e+00> : vector<8x128xf32>
    %66 = tpu.matmul %65, %0, %cst_45 {dimension_numbers = #tpu.dot_dimension_numbers<[1], [0], [0], [1], [0, 0, 1, 1], [], []>} : vector<8x32xbf16>, vector<32x128xbf16>, vector<8x128xf32> -> vector<8x128xf32>
    %67 = arith.addf %64, %66 : vector<8x128xf32>
    %68 = math.tanh %67 : vector<8x128xf32>
    %69 = vector.extract_strided_slice %68 {offsets = [0, 0], sizes = [8, 32], strides = [1, 1]} : vector<8x128xf32> to vector<8x32xf32>
    %cst_46 = arith.constant 5.000000e-01 : f32
    %70 = vector.broadcast %cst_46 : f32 to vector<8x32xf32>
    %71 = arith.mulf %70, %69 : vector<8x32xf32>
    %cst_47 = arith.constant 5.000000e-01 : f32
    %72 = vector.broadcast %cst_47 : f32 to vector<8x32xf32>
    %73 = arith.addf %71, %72 : vector<8x32xf32>
    %74 = vector.extract_strided_slice %68 {offsets = [0, 32], sizes = [8, 32], strides = [1, 1]} : vector<8x128xf32> to vector<8x32xf32>
    %cst_48 = arith.constant 5.000000e-01 : f32
    %75 = vector.broadcast %cst_48 : f32 to vector<8x32xf32>
    %76 = arith.mulf %75, %74 : vector<8x32xf32>
    %cst_49 = arith.constant 5.000000e-01 : f32
    %77 = vector.broadcast %cst_49 : f32 to vector<8x32xf32>
    %78 = arith.addf %76, %77 : vector<8x32xf32>
    %79 = vector.extract_strided_slice %68 {offsets = [0, 64], sizes = [8, 32], strides = [1, 1]} : vector<8x128xf32> to vector<8x32xf32>
    %80 = vector.extract_strided_slice %68 {offsets = [0, 96], sizes = [8, 32], strides = [1, 1]} : vector<8x128xf32> to vector<8x32xf32>
    %cst_50 = arith.constant 5.000000e-01 : f32
    %81 = vector.broadcast %cst_50 : f32 to vector<8x32xf32>
    %82 = arith.mulf %81, %80 : vector<8x32xf32>
    %cst_51 = arith.constant 5.000000e-01 : f32
    %83 = vector.broadcast %cst_51 : f32 to vector<8x32xf32>
    %84 = arith.addf %82, %83 : vector<8x32xf32>
    %85 = arith.mulf %78, %44 : vector<8x32xf32>
    %86 = arith.mulf %73, %79 : vector<8x32xf32>
    %87 = arith.addf %85, %86 : vector<8x32xf32>
    %88 = math.tanh %87 : vector<8x32xf32>
    %89 = arith.mulf %84, %88 : vector<8x32xf32>
    %c8 = arith.constant 8 : index
    %c0_52 = arith.constant 0 : index
    %90 = vector.load %arg12[%c8, %c0_52] : memref<64x32xf32, #tpu.memory_space<vmem>>, vector<8x32xf32>
    tpu.vector_store %arg12[%c8, %c0_52], %89 {strides = array<i32>} : memref<64x32xf32, #tpu.memory_space<vmem>>, vector<8x32xf32>,
    %c8_53 = arith.constant 8 : index
    %91 = memref.load %arg1[%c8_53] : memref<32xi32, #tpu.memory_space<smem>>
    %92 = arith.index_cast %91 : i32 to index
    %c0_54 = arith.constant 0 : index
    %93 = vector.load %arg2[%92, %c0_54] : memref<32x128xf32, #tpu.memory_space<vmem>>, vector<1x128xf32>
    %c0_55 = arith.constant 0 : index
    %c0_56 = arith.constant 0 : index
    %94 = vector.load %arg11[%c0_55, %c0_56] : memref<8x128xf32, #tpu.memory_space<vmem>>, vector<1x128xf32>
    tpu.vector_store %arg11[%c0_55, %c0_56], %93 {strides = array<i32>} : memref<8x128xf32, #tpu.memory_space<vmem>>, vector<1x128xf32>,
    %c9 = arith.constant 9 : index
    %95 = memref.load %arg1[%c9] : memref<32xi32, #tpu.memory_space<smem>>
    %96 = arith.index_cast %95 : i32 to index
    %c0_57 = arith.constant 0 : index
    %97 = vector.load %arg2[%96, %c0_57] : memref<32x128xf32, #tpu.memory_space<vmem>>, vector<1x128xf32>
    %c1_58 = arith.constant 1 : index
    %c0_59 = arith.constant 0 : index
    %98 = vector.load %arg11[%c1_58, %c0_59] : memref<8x128xf32, #tpu.memory_space<vmem>>, vector<1x128xf32>
    tpu.vector_store %arg11[%c1_58, %c0_59], %97 {strides = array<i32>} : memref<8x128xf32, #tpu.memory_space<vmem>>, vector<1x128xf32>,
    %c10 = arith.constant 10 : index
    %99 = memref.load %arg1[%c10] : memref<32xi32, #tpu.memory_space<smem>>
    %100 = arith.index_cast %99 : i32 to index
    %c0_60 = arith.constant 0 : index
    %101 = vector.load %arg2[%100, %c0_60] : memref<32x128xf32, #tpu.memory_space<vmem>>, vector<1x128xf32>
    %c2_61 = arith.constant 2 : index
    %c0_62 = arith.constant 0 : index
    %102 = vector.load %arg11[%c2_61, %c0_62] : memref<8x128xf32, #tpu.memory_space<vmem>>, vector<1x128xf32>
    tpu.vector_store %arg11[%c2_61, %c0_62], %101 {strides = array<i32>} : memref<8x128xf32, #tpu.memory_space<vmem>>, vector<1x128xf32>,
    %c11 = arith.constant 11 : index
    %103 = memref.load %arg1[%c11] : memref<32xi32, #tpu.memory_space<smem>>
    %104 = arith.index_cast %103 : i32 to index
    %c0_63 = arith.constant 0 : index
    %105 = vector.load %arg2[%104, %c0_63] : memref<32x128xf32, #tpu.memory_space<vmem>>, vector<1x128xf32>
    %c3_64 = arith.constant 3 : index
    %c0_65 = arith.constant 0 : index
    %106 = vector.load %arg11[%c3_64, %c0_65] : memref<8x128xf32, #tpu.memory_space<vmem>>, vector<1x128xf32>
    tpu.vector_store %arg11[%c3_64, %c0_65], %105 {strides = array<i32>} : memref<8x128xf32, #tpu.memory_space<vmem>>, vector<1x128xf32>,
    %c0_66 = arith.constant 0 : index
    %c0_67 = arith.constant 0 : index
    %107 = vector.load %arg11[%c0_66, %c0_67] : memref<8x128xf32, #tpu.memory_space<vmem>>, vector<8x128xf32>
    %108 = arith.truncf %89 : vector<8x32xf32> to vector<8x32xbf16>
    %cst_68 = arith.constant dense<0.000000e+00> : vector<8x128xf32>
    %109 = tpu.matmul %108, %0, %cst_68 {dimension_numbers = #tpu.dot_dimension_numbers<[1], [0], [0], [1], [0, 0, 1, 1], [], []>} : vector<8x32xbf16>, vector<32x128xbf16>, vector<8x128xf32> -> vector<8x128xf32>
    %110 = arith.addf %107, %109 : vector<8x128xf32>
    %111 = math.tanh %110 : vector<8x128xf32>
    %112 = vector.extract_strided_slice %111 {offsets = [0, 0], sizes = [8, 32], strides = [1, 1]} : vector<8x128xf32> to vector<8x32xf32>
    %cst_69 = arith.constant 5.000000e-01 : f32
    %113 = vector.broadcast %cst_69 : f32 to vector<8x32xf32>
    %114 = arith.mulf %113, %112 : vector<8x32xf32>
    %cst_70 = arith.constant 5.000000e-01 : f32
    %115 = vector.broadcast %cst_70 : f32 to vector<8x32xf32>
    %116 = arith.addf %114, %115 : vector<8x32xf32>
    %117 = vector.extract_strided_slice %111 {offsets = [0, 32], sizes = [8, 32], strides = [1, 1]} : vector<8x128xf32> to vector<8x32xf32>
    %cst_71 = arith.constant 5.000000e-01 : f32
    %118 = vector.broadcast %cst_71 : f32 to vector<8x32xf32>
    %119 = arith.mulf %118, %117 : vector<8x32xf32>
    %cst_72 = arith.constant 5.000000e-01 : f32
    %120 = vector.broadcast %cst_72 : f32 to vector<8x32xf32>
    %121 = arith.addf %119, %120 : vector<8x32xf32>
    %122 = vector.extract_strided_slice %111 {offsets = [0, 64], sizes = [8, 32], strides = [1, 1]} : vector<8x128xf32> to vector<8x32xf32>
    %123 = vector.extract_strided_slice %111 {offsets = [0, 96], sizes = [8, 32], strides = [1, 1]} : vector<8x128xf32> to vector<8x32xf32>
    %cst_73 = arith.constant 5.000000e-01 : f32
    %124 = vector.broadcast %cst_73 : f32 to vector<8x32xf32>
    %125 = arith.mulf %124, %123 : vector<8x32xf32>
    %cst_74 = arith.constant 5.000000e-01 : f32
    %126 = vector.broadcast %cst_74 : f32 to vector<8x32xf32>
    %127 = arith.addf %125, %126 : vector<8x32xf32>
    %128 = arith.mulf %121, %87 : vector<8x32xf32>
    %129 = arith.mulf %116, %122 : vector<8x32xf32>
    %130 = arith.addf %128, %129 : vector<8x32xf32>
    %131 = math.tanh %130 : vector<8x32xf32>
    %132 = arith.mulf %127, %131 : vector<8x32xf32>
    %c16 = arith.constant 16 : index
    %c0_75 = arith.constant 0 : index
    %133 = vector.load %arg12[%c16, %c0_75] : memref<64x32xf32, #tpu.memory_space<vmem>>, vector<8x32xf32>
    tpu.vector_store %arg12[%c16, %c0_75], %132 {strides = array<i32>} : memref<64x32xf32, #tpu.memory_space<vmem>>, vector<8x32xf32>,
    %c12 = arith.constant 12 : index
    %134 = memref.load %arg1[%c12] : memref<32xi32, #tpu.memory_space<smem>>
    %135 = arith.index_cast %134 : i32 to index
    %c0_76 = arith.constant 0 : index
    %136 = vector.load %arg2[%135, %c0_76] : memref<32x128xf32, #tpu.memory_space<vmem>>, vector<1x128xf32>
    %c0_77 = arith.constant 0 : index
    %c0_78 = arith.constant 0 : index
    %137 = vector.load %arg11[%c0_77, %c0_78] : memref<8x128xf32, #tpu.memory_space<vmem>>, vector<1x128xf32>
    tpu.vector_store %arg11[%c0_77, %c0_78], %136 {strides = array<i32>} : memref<8x128xf32, #tpu.memory_space<vmem>>, vector<1x128xf32>,
    %c13 = arith.constant 13 : index
    %138 = memref.load %arg1[%c13] : memref<32xi32, #tpu.memory_space<smem>>
    %139 = arith.index_cast %138 : i32 to index
    %c0_79 = arith.constant 0 : index
    %140 = vector.load %arg2[%139, %c0_79] : memref<32x128xf32, #tpu.memory_space<vmem>>, vector<1x128xf32>
    %c1_80 = arith.constant 1 : index
    %c0_81 = arith.constant 0 : index
    %141 = vector.load %arg11[%c1_80, %c0_81] : memref<8x128xf32, #tpu.memory_space<vmem>>, vector<1x128xf32>
    tpu.vector_store %arg11[%c1_80, %c0_81], %140 {strides = array<i32>} : memref<8x128xf32, #tpu.memory_space<vmem>>, vector<1x128xf32>,
    %c14 = arith.constant 14 : index
    %142 = memref.load %arg1[%c14] : memref<32xi32, #tpu.memory_space<smem>>
    %143 = arith.index_cast %142 : i32 to index
    %c0_82 = arith.constant 0 : index
    %144 = vector.load %arg2[%143, %c0_82] : memref<32x128xf32, #tpu.memory_space<vmem>>, vector<1x128xf32>
    %c2_83 = arith.constant 2 : index
    %c0_84 = arith.constant 0 : index
    %145 = vector.load %arg11[%c2_83, %c0_84] : memref<8x128xf32, #tpu.memory_space<vmem>>, vector<1x128xf32>
    tpu.vector_store %arg11[%c2_83, %c0_84], %144 {strides = array<i32>} : memref<8x128xf32, #tpu.memory_space<vmem>>, vector<1x128xf32>,
    %c15 = arith.constant 15 : index
    %146 = memref.load %arg1[%c15] : memref<32xi32, #tpu.memory_space<smem>>
    %147 = arith.index_cast %146 : i32 to index
    %c0_85 = arith.constant 0 : index
    %148 = vector.load %arg2[%147, %c0_85] : memref<32x128xf32, #tpu.memory_space<vmem>>, vector<1x128xf32>
    %c3_86 = arith.constant 3 : index
    %c0_87 = arith.constant 0 : index
    %149 = vector.load %arg11[%c3_86, %c0_87] : memref<8x128xf32, #tpu.memory_space<vmem>>, vector<1x128xf32>
    tpu.vector_store %arg11[%c3_86, %c0_87], %148 {strides = array<i32>} : memref<8x128xf32, #tpu.memory_space<vmem>>, vector<1x128xf32>,
    %c0_88 = arith.constant 0 : index
    %c0_89 = arith.constant 0 : index
    %150 = vector.load %arg11[%c0_88, %c0_89] : memref<8x128xf32, #tpu.memory_space<vmem>>, vector<8x128xf32>
    %151 = arith.truncf %132 : vector<8x32xf32> to vector<8x32xbf16>
    %cst_90 = arith.constant dense<0.000000e+00> : vector<8x128xf32>
    %152 = tpu.matmul %151, %0, %cst_90 {dimension_numbers = #tpu.dot_dimension_numbers<[1], [0], [0], [1], [0, 0, 1, 1], [], []>} : vector<8x32xbf16>, vector<32x128xbf16>, vector<8x128xf32> -> vector<8x128xf32>
    %153 = arith.addf %150, %152 : vector<8x128xf32>
    %154 = math.tanh %153 : vector<8x128xf32>
    %155 = vector.extract_strided_slice %154 {offsets = [0, 0], sizes = [8, 32], strides = [1, 1]} : vector<8x128xf32> to vector<8x32xf32>
    %cst_91 = arith.constant 5.000000e-01 : f32
    %156 = vector.broadcast %cst_91 : f32 to vector<8x32xf32>
    %157 = arith.mulf %156, %155 : vector<8x32xf32>
    %cst_92 = arith.constant 5.000000e-01 : f32
    %158 = vector.broadcast %cst_92 : f32 to vector<8x32xf32>
    %159 = arith.addf %157, %158 : vector<8x32xf32>
    %160 = vector.extract_strided_slice %154 {offsets = [0, 32], sizes = [8, 32], strides = [1, 1]} : vector<8x128xf32> to vector<8x32xf32>
    %cst_93 = arith.constant 5.000000e-01 : f32
    %161 = vector.broadcast %cst_93 : f32 to vector<8x32xf32>
    %162 = arith.mulf %161, %160 : vector<8x32xf32>
    %cst_94 = arith.constant 5.000000e-01 : f32
    %163 = vector.broadcast %cst_94 : f32 to vector<8x32xf32>
    %164 = arith.addf %162, %163 : vector<8x32xf32>
    %165 = vector.extract_strided_slice %154 {offsets = [0, 64], sizes = [8, 32], strides = [1, 1]} : vector<8x128xf32> to vector<8x32xf32>
    %166 = vector.extract_strided_slice %154 {offsets = [0, 96], sizes = [8, 32], strides = [1, 1]} : vector<8x128xf32> to vector<8x32xf32>
    %cst_95 = arith.constant 5.000000e-01 : f32
    %167 = vector.broadcast %cst_95 : f32 to vector<8x32xf32>
    %168 = arith.mulf %167, %166 : vector<8x32xf32>
    %cst_96 = arith.constant 5.000000e-01 : f32
    %169 = vector.broadcast %cst_96 : f32 to vector<8x32xf32>
    %170 = arith.addf %168, %169 : vector<8x32xf32>
    %171 = arith.mulf %164, %130 : vector<8x32xf32>
    %172 = arith.mulf %159, %165 : vector<8x32xf32>
    %173 = arith.addf %171, %172 : vector<8x32xf32>
    %174 = math.tanh %173 : vector<8x32xf32>
    %175 = arith.mulf %170, %174 : vector<8x32xf32>
    %c24 = arith.constant 24 : index
    %c0_97 = arith.constant 0 : index
    %176 = vector.load %arg12[%c24, %c0_97] : memref<64x32xf32, #tpu.memory_space<vmem>>, vector<8x32xf32>
    tpu.vector_store %arg12[%c24, %c0_97], %175 {strides = array<i32>} : memref<64x32xf32, #tpu.memory_space<vmem>>, vector<8x32xf32>,
    %c16_98 = arith.constant 16 : index
    %177 = memref.load %arg1[%c16_98] : memref<32xi32, #tpu.memory_space<smem>>
    %178 = arith.index_cast %177 : i32 to index
    %c0_99 = arith.constant 0 : index
    %179 = vector.load %arg2[%178, %c0_99] : memref<32x128xf32, #tpu.memory_space<vmem>>, vector<1x128xf32>
    %c0_100 = arith.constant 0 : index
    %c0_101 = arith.constant 0 : index
    %180 = vector.load %arg11[%c0_100, %c0_101] : memref<8x128xf32, #tpu.memory_space<vmem>>, vector<1x128xf32>
    tpu.vector_store %arg11[%c0_100, %c0_101], %179 {strides = array<i32>} : memref<8x128xf32, #tpu.memory_space<vmem>>, vector<1x128xf32>,
    %c17 = arith.constant 17 : index
    %181 = memref.load %arg1[%c17] : memref<32xi32, #tpu.memory_space<smem>>
    %182 = arith.index_cast %181 : i32 to index
    %c0_102 = arith.constant 0 : index
    %183 = vector.load %arg2[%182, %c0_102] : memref<32x128xf32, #tpu.memory_space<vmem>>, vector<1x128xf32>
    %c1_103 = arith.constant 1 : index
    %c0_104 = arith.constant 0 : index
    %184 = vector.load %arg11[%c1_103, %c0_104] : memref<8x128xf32, #tpu.memory_space<vmem>>, vector<1x128xf32>
    tpu.vector_store %arg11[%c1_103, %c0_104], %183 {strides = array<i32>} : memref<8x128xf32, #tpu.memory_space<vmem>>, vector<1x128xf32>,
    %c18 = arith.constant 18 : index
    %185 = memref.load %arg1[%c18] : memref<32xi32, #tpu.memory_space<smem>>
    %186 = arith.index_cast %185 : i32 to index
    %c0_105 = arith.constant 0 : index
    %187 = vector.load %arg2[%186, %c0_105] : memref<32x128xf32, #tpu.memory_space<vmem>>, vector<1x128xf32>
    %c2_106 = arith.constant 2 : index
    %c0_107 = arith.constant 0 : index
    %188 = vector.load %arg11[%c2_106, %c0_107] : memref<8x128xf32, #tpu.memory_space<vmem>>, vector<1x128xf32>
    tpu.vector_store %arg11[%c2_106, %c0_107], %187 {strides = array<i32>} : memref<8x128xf32, #tpu.memory_space<vmem>>, vector<1x128xf32>,
    %c19 = arith.constant 19 : index
    %189 = memref.load %arg1[%c19] : memref<32xi32, #tpu.memory_space<smem>>
    %190 = arith.index_cast %189 : i32 to index
    %c0_108 = arith.constant 0 : index
    %191 = vector.load %arg2[%190, %c0_108] : memref<32x128xf32, #tpu.memory_space<vmem>>, vector<1x128xf32>
    %c3_109 = arith.constant 3 : index
    %c0_110 = arith.constant 0 : index
    %192 = vector.load %arg11[%c3_109, %c0_110] : memref<8x128xf32, #tpu.memory_space<vmem>>, vector<1x128xf32>
    tpu.vector_store %arg11[%c3_109, %c0_110], %191 {strides = array<i32>} : memref<8x128xf32, #tpu.memory_space<vmem>>, vector<1x128xf32>,
    %c0_111 = arith.constant 0 : index
    %c0_112 = arith.constant 0 : index
    %193 = vector.load %arg11[%c0_111, %c0_112] : memref<8x128xf32, #tpu.memory_space<vmem>>, vector<8x128xf32>
    %194 = arith.truncf %175 : vector<8x32xf32> to vector<8x32xbf16>
    %cst_113 = arith.constant dense<0.000000e+00> : vector<8x128xf32>
    %195 = tpu.matmul %194, %0, %cst_113 {dimension_numbers = #tpu.dot_dimension_numbers<[1], [0], [0], [1], [0, 0, 1, 1], [], []>} : vector<8x32xbf16>, vector<32x128xbf16>, vector<8x128xf32> -> vector<8x128xf32>
    %196 = arith.addf %193, %195 : vector<8x128xf32>
    %197 = math.tanh %196 : vector<8x128xf32>
    %198 = vector.extract_strided_slice %197 {offsets = [0, 0], sizes = [8, 32], strides = [1, 1]} : vector<8x128xf32> to vector<8x32xf32>
    %cst_114 = arith.constant 5.000000e-01 : f32
    %199 = vector.broadcast %cst_114 : f32 to vector<8x32xf32>
    %200 = arith.mulf %199, %198 : vector<8x32xf32>
    %cst_115 = arith.constant 5.000000e-01 : f32
    %201 = vector.broadcast %cst_115 : f32 to vector<8x32xf32>
    %202 = arith.addf %200, %201 : vector<8x32xf32>
    %203 = vector.extract_strided_slice %197 {offsets = [0, 32], sizes = [8, 32], strides = [1, 1]} : vector<8x128xf32> to vector<8x32xf32>
    %cst_116 = arith.constant 5.000000e-01 : f32
    %204 = vector.broadcast %cst_116 : f32 to vector<8x32xf32>
    %205 = arith.mulf %204, %203 : vector<8x32xf32>
    %cst_117 = arith.constant 5.000000e-01 : f32
    %206 = vector.broadcast %cst_117 : f32 to vector<8x32xf32>
    %207 = arith.addf %205, %206 : vector<8x32xf32>
    %208 = vector.extract_strided_slice %197 {offsets = [0, 64], sizes = [8, 32], strides = [1, 1]} : vector<8x128xf32> to vector<8x32xf32>
    %209 = vector.extract_strided_slice %197 {offsets = [0, 96], sizes = [8, 32], strides = [1, 1]} : vector<8x128xf32> to vector<8x32xf32>
    %cst_118 = arith.constant 5.000000e-01 : f32
    %210 = vector.broadcast %cst_118 : f32 to vector<8x32xf32>
    %211 = arith.mulf %210, %209 : vector<8x32xf32>
    %cst_119 = arith.constant 5.000000e-01 : f32
    %212 = vector.broadcast %cst_119 : f32 to vector<8x32xf32>
    %213 = arith.addf %211, %212 : vector<8x32xf32>
    %214 = arith.mulf %207, %173 : vector<8x32xf32>
    %215 = arith.mulf %202, %208 : vector<8x32xf32>
    %216 = arith.addf %214, %215 : vector<8x32xf32>
    %217 = math.tanh %216 : vector<8x32xf32>
    %218 = arith.mulf %213, %217 : vector<8x32xf32>
    %c32 = arith.constant 32 : index
    %c0_120 = arith.constant 0 : index
    %219 = vector.load %arg12[%c32, %c0_120] : memref<64x32xf32, #tpu.memory_space<vmem>>, vector<8x32xf32>
    tpu.vector_store %arg12[%c32, %c0_120], %218 {strides = array<i32>} : memref<64x32xf32, #tpu.memory_space<vmem>>, vector<8x32xf32>,
    %c20 = arith.constant 20 : index
    %220 = memref.load %arg1[%c20] : memref<32xi32, #tpu.memory_space<smem>>
    %221 = arith.index_cast %220 : i32 to index
    %c0_121 = arith.constant 0 : index
    %222 = vector.load %arg2[%221, %c0_121] : memref<32x128xf32, #tpu.memory_space<vmem>>, vector<1x128xf32>
    %c0_122 = arith.constant 0 : index
    %c0_123 = arith.constant 0 : index
    %223 = vector.load %arg11[%c0_122, %c0_123] : memref<8x128xf32, #tpu.memory_space<vmem>>, vector<1x128xf32>
    tpu.vector_store %arg11[%c0_122, %c0_123], %222 {strides = array<i32>} : memref<8x128xf32, #tpu.memory_space<vmem>>, vector<1x128xf32>,
    %c21 = arith.constant 21 : index
    %224 = memref.load %arg1[%c21] : memref<32xi32, #tpu.memory_space<smem>>
    %225 = arith.index_cast %224 : i32 to index
    %c0_124 = arith.constant 0 : index
    %226 = vector.load %arg2[%225, %c0_124] : memref<32x128xf32, #tpu.memory_space<vmem>>, vector<1x128xf32>
    %c1_125 = arith.constant 1 : index
    %c0_126 = arith.constant 0 : index
    %227 = vector.load %arg11[%c1_125, %c0_126] : memref<8x128xf32, #tpu.memory_space<vmem>>, vector<1x128xf32>
    tpu.vector_store %arg11[%c1_125, %c0_126], %226 {strides = array<i32>} : memref<8x128xf32, #tpu.memory_space<vmem>>, vector<1x128xf32>,
    %c22 = arith.constant 22 : index
    %228 = memref.load %arg1[%c22] : memref<32xi32, #tpu.memory_space<smem>>
    %229 = arith.index_cast %228 : i32 to index
    %c0_127 = arith.constant 0 : index
    %230 = vector.load %arg2[%229, %c0_127] : memref<32x128xf32, #tpu.memory_space<vmem>>, vector<1x128xf32>
    %c2_128 = arith.constant 2 : index
    %c0_129 = arith.constant 0 : index
    %231 = vector.load %arg11[%c2_128, %c0_129] : memref<8x128xf32, #tpu.memory_space<vmem>>, vector<1x128xf32>
    tpu.vector_store %arg11[%c2_128, %c0_129], %230 {strides = array<i32>} : memref<8x128xf32, #tpu.memory_space<vmem>>, vector<1x128xf32>,
    %c23 = arith.constant 23 : index
    %232 = memref.load %arg1[%c23] : memref<32xi32, #tpu.memory_space<smem>>
    %233 = arith.index_cast %232 : i32 to index
    %c0_130 = arith.constant 0 : index
    %234 = vector.load %arg2[%233, %c0_130] : memref<32x128xf32, #tpu.memory_space<vmem>>, vector<1x128xf32>
    %c3_131 = arith.constant 3 : index
    %c0_132 = arith.constant 0 : index
    %235 = vector.load %arg11[%c3_131, %c0_132] : memref<8x128xf32, #tpu.memory_space<vmem>>, vector<1x128xf32>
    tpu.vector_store %arg11[%c3_131, %c0_132], %234 {strides = array<i32>} : memref<8x128xf32, #tpu.memory_space<vmem>>, vector<1x128xf32>,
    %c0_133 = arith.constant 0 : index
    %c0_134 = arith.constant 0 : index
    %236 = vector.load %arg11[%c0_133, %c0_134] : memref<8x128xf32, #tpu.memory_space<vmem>>, vector<8x128xf32>
    %237 = arith.truncf %218 : vector<8x32xf32> to vector<8x32xbf16>
    %cst_135 = arith.constant dense<0.000000e+00> : vector<8x128xf32>
    %238 = tpu.matmul %237, %0, %cst_135 {dimension_numbers = #tpu.dot_dimension_numbers<[1], [0], [0], [1], [0, 0, 1, 1], [], []>} : vector<8x32xbf16>, vector<32x128xbf16>, vector<8x128xf32> -> vector<8x128xf32>
    %239 = arith.addf %236, %238 : vector<8x128xf32>
    %240 = math.tanh %239 : vector<8x128xf32>
    %241 = vector.extract_strided_slice %240 {offsets = [0, 0], sizes = [8, 32], strides = [1, 1]} : vector<8x128xf32> to vector<8x32xf32>
    %cst_136 = arith.constant 5.000000e-01 : f32
    %242 = vector.broadcast %cst_136 : f32 to vector<8x32xf32>
    %243 = arith.mulf %242, %241 : vector<8x32xf32>
    %cst_137 = arith.constant 5.000000e-01 : f32
    %244 = vector.broadcast %cst_137 : f32 to vector<8x32xf32>
    %245 = arith.addf %243, %244 : vector<8x32xf32>
    %246 = vector.extract_strided_slice %240 {offsets = [0, 32], sizes = [8, 32], strides = [1, 1]} : vector<8x128xf32> to vector<8x32xf32>
    %cst_138 = arith.constant 5.000000e-01 : f32
    %247 = vector.broadcast %cst_138 : f32 to vector<8x32xf32>
    %248 = arith.mulf %247, %246 : vector<8x32xf32>
    %cst_139 = arith.constant 5.000000e-01 : f32
    %249 = vector.broadcast %cst_139 : f32 to vector<8x32xf32>
    %250 = arith.addf %248, %249 : vector<8x32xf32>
    %251 = vector.extract_strided_slice %240 {offsets = [0, 64], sizes = [8, 32], strides = [1, 1]} : vector<8x128xf32> to vector<8x32xf32>
    %252 = vector.extract_strided_slice %240 {offsets = [0, 96], sizes = [8, 32], strides = [1, 1]} : vector<8x128xf32> to vector<8x32xf32>
    %cst_140 = arith.constant 5.000000e-01 : f32
    %253 = vector.broadcast %cst_140 : f32 to vector<8x32xf32>
    %254 = arith.mulf %253, %252 : vector<8x32xf32>
    %cst_141 = arith.constant 5.000000e-01 : f32
    %255 = vector.broadcast %cst_141 : f32 to vector<8x32xf32>
    %256 = arith.addf %254, %255 : vector<8x32xf32>
    %257 = arith.mulf %250, %216 : vector<8x32xf32>
    %258 = arith.mulf %245, %251 : vector<8x32xf32>
    %259 = arith.addf %257, %258 : vector<8x32xf32>
    %260 = math.tanh %259 : vector<8x32xf32>
    %261 = arith.mulf %256, %260 : vector<8x32xf32>
    %c40 = arith.constant 40 : index
    %c0_142 = arith.constant 0 : index
    %262 = vector.load %arg12[%c40, %c0_142] : memref<64x32xf32, #tpu.memory_space<vmem>>, vector<8x32xf32>
    tpu.vector_store %arg12[%c40, %c0_142], %261 {strides = array<i32>} : memref<64x32xf32, #tpu.memory_space<vmem>>, vector<8x32xf32>,
    %c24_143 = arith.constant 24 : index
    %263 = memref.load %arg1[%c24_143] : memref<32xi32, #tpu.memory_space<smem>>
    %264 = arith.index_cast %263 : i32 to index
    %c0_144 = arith.constant 0 : index
    %265 = vector.load %arg2[%264, %c0_144] : memref<32x128xf32, #tpu.memory_space<vmem>>, vector<1x128xf32>
    %c0_145 = arith.constant 0 : index
    %c0_146 = arith.constant 0 : index
    %266 = vector.load %arg11[%c0_145, %c0_146] : memref<8x128xf32, #tpu.memory_space<vmem>>, vector<1x128xf32>
    tpu.vector_store %arg11[%c0_145, %c0_146], %265 {strides = array<i32>} : memref<8x128xf32, #tpu.memory_space<vmem>>, vector<1x128xf32>,
    %c25 = arith.constant 25 : index
    %267 = memref.load %arg1[%c25] : memref<32xi32, #tpu.memory_space<smem>>
    %268 = arith.index_cast %267 : i32 to index
    %c0_147 = arith.constant 0 : index
    %269 = vector.load %arg2[%268, %c0_147] : memref<32x128xf32, #tpu.memory_space<vmem>>, vector<1x128xf32>
    %c1_148 = arith.constant 1 : index
    %c0_149 = arith.constant 0 : index
    %270 = vector.load %arg11[%c1_148, %c0_149] : memref<8x128xf32, #tpu.memory_space<vmem>>, vector<1x128xf32>
    tpu.vector_store %arg11[%c1_148, %c0_149], %269 {strides = array<i32>} : memref<8x128xf32, #tpu.memory_space<vmem>>, vector<1x128xf32>,
    %c26 = arith.constant 26 : index
    %271 = memref.load %arg1[%c26] : memref<32xi32, #tpu.memory_space<smem>>
    %272 = arith.index_cast %271 : i32 to index
    %c0_150 = arith.constant 0 : index
    %273 = vector.load %arg2[%272, %c0_150] : memref<32x128xf32, #tpu.memory_space<vmem>>, vector<1x128xf32>
    %c2_151 = arith.constant 2 : index
    %c0_152 = arith.constant 0 : index
    %274 = vector.load %arg11[%c2_151, %c0_152] : memref<8x128xf32, #tpu.memory_space<vmem>>, vector<1x128xf32>
    tpu.vector_store %arg11[%c2_151, %c0_152], %273 {strides = array<i32>} : memref<8x128xf32, #tpu.memory_space<vmem>>, vector<1x128xf32>,
    %c27 = arith.constant 27 : index
    %275 = memref.load %arg1[%c27] : memref<32xi32, #tpu.memory_space<smem>>
    %276 = arith.index_cast %275 : i32 to index
    %c0_153 = arith.constant 0 : index
    %277 = vector.load %arg2[%276, %c0_153] : memref<32x128xf32, #tpu.memory_space<vmem>>, vector<1x128xf32>
    %c3_154 = arith.constant 3 : index
    %c0_155 = arith.constant 0 : index
    %278 = vector.load %arg11[%c3_154, %c0_155] : memref<8x128xf32, #tpu.memory_space<vmem>>, vector<1x128xf32>
    tpu.vector_store %arg11[%c3_154, %c0_155], %277 {strides = array<i32>} : memref<8x128xf32, #tpu.memory_space<vmem>>, vector<1x128xf32>,
    %c0_156 = arith.constant 0 : index
    %c0_157 = arith.constant 0 : index
    %279 = vector.load %arg11[%c0_156, %c0_157] : memref<8x128xf32, #tpu.memory_space<vmem>>, vector<8x128xf32>
    %280 = arith.truncf %261 : vector<8x32xf32> to vector<8x32xbf16>
    %cst_158 = arith.constant dense<0.000000e+00> : vector<8x128xf32>
    %281 = tpu.matmul %280, %0, %cst_158 {dimension_numbers = #tpu.dot_dimension_numbers<[1], [0], [0], [1], [0, 0, 1, 1], [], []>} : vector<8x32xbf16>, vector<32x128xbf16>, vector<8x128xf32> -> vector<8x128xf32>
    %282 = arith.addf %279, %281 : vector<8x128xf32>
    %283 = math.tanh %282 : vector<8x128xf32>
    %284 = vector.extract_strided_slice %283 {offsets = [0, 0], sizes = [8, 32], strides = [1, 1]} : vector<8x128xf32> to vector<8x32xf32>
    %cst_159 = arith.constant 5.000000e-01 : f32
    %285 = vector.broadcast %cst_159 : f32 to vector<8x32xf32>
    %286 = arith.mulf %285, %284 : vector<8x32xf32>
    %cst_160 = arith.constant 5.000000e-01 : f32
    %287 = vector.broadcast %cst_160 : f32 to vector<8x32xf32>
    %288 = arith.addf %286, %287 : vector<8x32xf32>
    %289 = vector.extract_strided_slice %283 {offsets = [0, 32], sizes = [8, 32], strides = [1, 1]} : vector<8x128xf32> to vector<8x32xf32>
    %cst_161 = arith.constant 5.000000e-01 : f32
    %290 = vector.broadcast %cst_161 : f32 to vector<8x32xf32>
    %291 = arith.mulf %290, %289 : vector<8x32xf32>
    %cst_162 = arith.constant 5.000000e-01 : f32
    %292 = vector.broadcast %cst_162 : f32 to vector<8x32xf32>
    %293 = arith.addf %291, %292 : vector<8x32xf32>
    %294 = vector.extract_strided_slice %283 {offsets = [0, 64], sizes = [8, 32], strides = [1, 1]} : vector<8x128xf32> to vector<8x32xf32>
    %295 = vector.extract_strided_slice %283 {offsets = [0, 96], sizes = [8, 32], strides = [1, 1]} : vector<8x128xf32> to vector<8x32xf32>
    %cst_163 = arith.constant 5.000000e-01 : f32
    %296 = vector.broadcast %cst_163 : f32 to vector<8x32xf32>
    %297 = arith.mulf %296, %295 : vector<8x32xf32>
    %cst_164 = arith.constant 5.000000e-01 : f32
    %298 = vector.broadcast %cst_164 : f32 to vector<8x32xf32>
    %299 = arith.addf %297, %298 : vector<8x32xf32>
    %300 = arith.mulf %293, %259 : vector<8x32xf32>
    %301 = arith.mulf %288, %294 : vector<8x32xf32>
    %302 = arith.addf %300, %301 : vector<8x32xf32>
    %303 = math.tanh %302 : vector<8x32xf32>
    %304 = arith.mulf %299, %303 : vector<8x32xf32>
    %c48 = arith.constant 48 : index
    %c0_165 = arith.constant 0 : index
    %305 = vector.load %arg12[%c48, %c0_165] : memref<64x32xf32, #tpu.memory_space<vmem>>, vector<8x32xf32>
    tpu.vector_store %arg12[%c48, %c0_165], %304 {strides = array<i32>} : memref<64x32xf32, #tpu.memory_space<vmem>>, vector<8x32xf32>,
    %c28 = arith.constant 28 : index
    %306 = memref.load %arg1[%c28] : memref<32xi32, #tpu.memory_space<smem>>
    %307 = arith.index_cast %306 : i32 to index
    %c0_166 = arith.constant 0 : index
    %308 = vector.load %arg2[%307, %c0_166] : memref<32x128xf32, #tpu.memory_space<vmem>>, vector<1x128xf32>
    %c0_167 = arith.constant 0 : index
    %c0_168 = arith.constant 0 : index
    %309 = vector.load %arg11[%c0_167, %c0_168] : memref<8x128xf32, #tpu.memory_space<vmem>>, vector<1x128xf32>
    tpu.vector_store %arg11[%c0_167, %c0_168], %308 {strides = array<i32>} : memref<8x128xf32, #tpu.memory_space<vmem>>, vector<1x128xf32>,
    %c29 = arith.constant 29 : index
    %310 = memref.load %arg1[%c29] : memref<32xi32, #tpu.memory_space<smem>>
    %311 = arith.index_cast %310 : i32 to index
    %c0_169 = arith.constant 0 : index
    %312 = vector.load %arg2[%311, %c0_169] : memref<32x128xf32, #tpu.memory_space<vmem>>, vector<1x128xf32>
    %c1_170 = arith.constant 1 : index
    %c0_171 = arith.constant 0 : index
    %313 = vector.load %arg11[%c1_170, %c0_171] : memref<8x128xf32, #tpu.memory_space<vmem>>, vector<1x128xf32>
    tpu.vector_store %arg11[%c1_170, %c0_171], %312 {strides = array<i32>} : memref<8x128xf32, #tpu.memory_space<vmem>>, vector<1x128xf32>,
    %c30 = arith.constant 30 : index
    %314 = memref.load %arg1[%c30] : memref<32xi32, #tpu.memory_space<smem>>
    %315 = arith.index_cast %314 : i32 to index
    %c0_172 = arith.constant 0 : index
    %316 = vector.load %arg2[%315, %c0_172] : memref<32x128xf32, #tpu.memory_space<vmem>>, vector<1x128xf32>
    %c2_173 = arith.constant 2 : index
    %c0_174 = arith.constant 0 : index
    %317 = vector.load %arg11[%c2_173, %c0_174] : memref<8x128xf32, #tpu.memory_space<vmem>>, vector<1x128xf32>
    tpu.vector_store %arg11[%c2_173, %c0_174], %316 {strides = array<i32>} : memref<8x128xf32, #tpu.memory_space<vmem>>, vector<1x128xf32>,
    %c31 = arith.constant 31 : index
    %318 = memref.load %arg1[%c31] : memref<32xi32, #tpu.memory_space<smem>>
    %319 = arith.index_cast %318 : i32 to index
    %c0_175 = arith.constant 0 : index
    %320 = vector.load %arg2[%319, %c0_175] : memref<32x128xf32, #tpu.memory_space<vmem>>, vector<1x128xf32>
    %c3_176 = arith.constant 3 : index
    %c0_177 = arith.constant 0 : index
    %321 = vector.load %arg11[%c3_176, %c0_177] : memref<8x128xf32, #tpu.memory_space<vmem>>, vector<1x128xf32>
    tpu.vector_store %arg11[%c3_176, %c0_177], %320 {strides = array<i32>} : memref<8x128xf32, #tpu.memory_space<vmem>>, vector<1x128xf32>,
    %c0_178 = arith.constant 0 : index
    %c0_179 = arith.constant 0 : index
    %322 = vector.load %arg11[%c0_178, %c0_179] : memref<8x128xf32, #tpu.memory_space<vmem>>, vector<8x128xf32>
    %323 = arith.truncf %304 : vector<8x32xf32> to vector<8x32xbf16>
    %cst_180 = arith.constant dense<0.000000e+00> : vector<8x128xf32>
    %324 = tpu.matmul %323, %0, %cst_180 {dimension_numbers = #tpu.dot_dimension_numbers<[1], [0], [0], [1], [0, 0, 1, 1], [], []>} : vector<8x32xbf16>, vector<32x128xbf16>, vector<8x128xf32> -> vector<8x128xf32>
    %325 = arith.addf %322, %324 : vector<8x128xf32>
    %326 = math.tanh %325 : vector<8x128xf32>
    %327 = vector.extract_strided_slice %326 {offsets = [0, 0], sizes = [8, 32], strides = [1, 1]} : vector<8x128xf32> to vector<8x32xf32>
    %cst_181 = arith.constant 5.000000e-01 : f32
    %328 = vector.broadcast %cst_181 : f32 to vector<8x32xf32>
    %329 = arith.mulf %328, %327 : vector<8x32xf32>
    %cst_182 = arith.constant 5.000000e-01 : f32
    %330 = vector.broadcast %cst_182 : f32 to vector<8x32xf32>
    %331 = arith.addf %329, %330 : vector<8x32xf32>
    %332 = vector.extract_strided_slice %326 {offsets = [0, 32], sizes = [8, 32], strides = [1, 1]} : vector<8x128xf32> to vector<8x32xf32>
    %cst_183 = arith.constant 5.000000e-01 : f32
    %333 = vector.broadcast %cst_183 : f32 to vector<8x32xf32>
    %334 = arith.mulf %333, %332 : vector<8x32xf32>
    %cst_184 = arith.constant 5.000000e-01 : f32
    %335 = vector.broadcast %cst_184 : f32 to vector<8x32xf32>
    %336 = arith.addf %334, %335 : vector<8x32xf32>
    %337 = vector.extract_strided_slice %326 {offsets = [0, 64], sizes = [8, 32], strides = [1, 1]} : vector<8x128xf32> to vector<8x32xf32>
    %338 = vector.extract_strided_slice %326 {offsets = [0, 96], sizes = [8, 32], strides = [1, 1]} : vector<8x128xf32> to vector<8x32xf32>
    %cst_185 = arith.constant 5.000000e-01 : f32
    %339 = vector.broadcast %cst_185 : f32 to vector<8x32xf32>
    %340 = arith.mulf %339, %338 : vector<8x32xf32>
    %cst_186 = arith.constant 5.000000e-01 : f32
    %341 = vector.broadcast %cst_186 : f32 to vector<8x32xf32>
    %342 = arith.addf %340, %341 : vector<8x32xf32>
    %343 = arith.mulf %336, %302 : vector<8x32xf32>
    %344 = arith.mulf %331, %337 : vector<8x32xf32>
    %345 = arith.addf %343, %344 : vector<8x32xf32>
    %346 = math.tanh %345 : vector<8x32xf32>
    %347 = arith.mulf %342, %346 : vector<8x32xf32>
    %c56 = arith.constant 56 : index
    %c0_187 = arith.constant 0 : index
    %348 = vector.load %arg12[%c56, %c0_187] : memref<64x32xf32, #tpu.memory_space<vmem>>, vector<8x32xf32>
    tpu.vector_store %arg12[%c56, %c0_187], %347 {strides = array<i32>} : memref<64x32xf32, #tpu.memory_space<vmem>>, vector<8x32xf32>,
    %c0_188 = arith.constant 0 : index
    %c0_189 = arith.constant 0 : index
    %349 = vector.load %arg9[%c0_188, %c0_189] : memref<8x32xf32, #tpu.memory_space<vmem>>, vector<8x32xf32>
    tpu.vector_store %arg9[%c0_188, %c0_189], %347 {strides = array<i32>} : memref<8x32xf32, #tpu.memory_space<vmem>>, vector<8x32xf32>,
    %c0_190 = arith.constant 0 : index
    %c0_191 = arith.constant 0 : index
    %350 = vector.load %arg10[%c0_190, %c0_191] : memref<8x32xf32, #tpu.memory_space<vmem>>, vector<8x32xf32>
    tpu.vector_store %arg10[%c0_190, %c0_191], %345 {strides = array<i32>} : memref<8x32xf32, #tpu.memory_space<vmem>>, vector<8x32xf32>,
    %c0_192 = arith.constant 0 : index
    %c0_193 = arith.constant 0 : index
    %351 = vector.load %arg12[%c0_192, %c0_193] : memref<64x32xf32, #tpu.memory_space<vmem>>, vector<64x32xf32>
    %352 = arith.truncf %351 : vector<64x32xf32> to vector<64x32xbf16>
    %c0_194 = arith.constant 0 : index
    %c0_195 = arith.constant 0 : index
    %353 = vector.load %arg4[%c0_194, %c0_195] : memref<32x128xbf16, #tpu.memory_space<vmem>>, vector<32x128xbf16>
    %cst_196 = arith.constant dense<0.000000e+00> : vector<64x128xf32>
    %354 = tpu.matmul %352, %353, %cst_196 {dimension_numbers = #tpu.dot_dimension_numbers<[1], [0], [0], [1], [0, 0, 1, 1], [], []>} : vector<64x32xbf16>, vector<32x128xbf16>, vector<64x128xf32> -> vector<64x128xf32>
    %c0_197 = arith.constant 0 : index
    %c0_198 = arith.constant 0 : index
    %355 = vector.load %arg5[%c0_197, %c0_198] : memref<1x128xf32, #tpu.memory_space<vmem>>, vector<1x128xf32>
    %356 = vector.broadcast %355 : vector<1x128xf32> to vector<64x128xf32>
    %357 = arith.addf %354, %356 : vector<64x128xf32>
    %c0_199 = arith.constant 0 : index
    %c0_200 = arith.constant 0 : index
    %358 = vector.load %arg8[%c0_199, %c0_200] : memref<64x128xf32, #tpu.memory_space<vmem>>, vector<64x128xf32>
    tpu.vector_store %arg8[%c0_199, %c0_200], %357 {strides = array<i32>} : memref<64x128xf32, #tpu.memory_space<vmem>>, vector<64x128xf32>,
    return
  }
  func.func @transform_0(%arg0: i32, %arg1: memref<32xi32, #tpu.memory_space<smem>>) -> (i32, i32) {
    %c0_i32 = arith.constant 0 : i32
    %c0_i32_0 = arith.constant 0 : i32
    %c0_i32_1 = arith.constant 0 : i32
    return %c0_i32, %c0_i32_0 : i32, i32
  }
  func.func @transform_1(%arg0: i32, %arg1: memref<32xi32, #tpu.memory_space<smem>>) -> (i32, i32) {
    %c0_i32 = arith.constant 0 : i32
    %c0_i32_0 = arith.constant 0 : i32
    %c0_i32_1 = arith.constant 0 : i32
    return %c0_i32, %c0_i32_0 : i32, i32
  }
  func.func @transform_2(%arg0: i32, %arg1: memref<32xi32, #tpu.memory_space<smem>>) -> (i32, i32) {
    %c0_i32 = arith.constant 0 : i32
    %c0_i32_0 = arith.constant 0 : i32
    %c0_i32_1 = arith.constant 0 : i32
    return %c0_i32, %c0_i32_0 : i32, i32
  }
  func.func @transform_3(%arg0: i32, %arg1: memref<32xi32, #tpu.memory_space<smem>>) -> (i32, i32) {
    %c0_i32 = arith.constant 0 : i32
    %c0_i32_0 = arith.constant 0 : i32
    %c0_i32_1 = arith.constant 0 : i32
    return %c0_i32, %c0_i32_0 : i32, i32
  }
  func.func @transform_4(%arg0: i32, %arg1: memref<32xi32, #tpu.memory_space<smem>>) -> (i32, i32) {
    %c0_i32 = arith.constant 0 : i32
    %c0_i32_0 = arith.constant 0 : i32
    %c0_i32_1 = arith.constant 0 : i32
    return %c0_i32, %c0_i32_0 : i32, i32
  }
  func.func @transform_5(%arg0: i32, %arg1: memref<32xi32, #tpu.memory_space<smem>>) -> (i32, i32) {
    %c0_i32 = arith.constant 0 : i32
    %c0_i32_0 = arith.constant 0 : i32
    %c0_i32_1 = arith.constant 0 : i32
    return %c0_i32, %c0_i32_0 : i32, i32
  }
  func.func @transform_6(%arg0: i32, %arg1: memref<32xi32, #tpu.memory_space<smem>>) -> (i32, i32) {
    %c0_i32 = arith.constant 0 : i32
    %c0_i32_0 = arith.constant 0 : i32
    %c0_i32_1 = arith.constant 0 : i32
    return %c0_i32, %c0_i32_0 : i32, i32
  }
  func.func @transform_7(%arg0: i32, %arg1: memref<32xi32, #tpu.memory_space<smem>>) -> (i32, i32) {
    %c0_i32 = arith.constant 0 : i32
    %c0_i32_0 = arith.constant 0 : i32
    %c0_i32_1 = arith.constant 0 : i32
    return %c0_i32, %c0_i32_0 : i32, i32
  }
  func.func @transform_8(%arg0: i32, %arg1: memref<32xi32, #tpu.memory_space<smem>>) -> (i32, i32) {
    %c0_i32 = arith.constant 0 : i32
    %c0_i32_0 = arith.constant 0 : i32
    %c0_i32_1 = arith.constant 0 : i32
    return %c0_i32, %c0_i32_0 : i32, i32
  }
}

</mosaic_0001>

<bundles_post_ra>
// kernel: char_decoder_forward.1
= control target key start
LH: loop header
LB: loop body
LE: loop exit
PB: predicated region body
PF: predicated region fallthrough
CT: control target
= control target key end

     0   :  { %s1506_s0 = inlined_call_operand.vmem [shape: s32[32], index: 0, kind: input, shape index: {}]   ;;  %s1507_s1 = inlined_call_operand.vmem [shape: f32[32,128], index: 1, kind: input, shape index: {}]   ;;  %s1508_s2 = inlined_call_operand.vmem [shape: bf16[32,128], index: 2, kind: input, shape index: {}]   ;;  %s1509_s3 = inlined_call_operand.vmem [shape: bf16[32,128], index: 3, kind: input, shape index: {}]   ;;  %s1510_s4 = inlined_call_operand.vmem [shape: f32[1,128], index: 4, kind: input, shape index: {}]   ;;  %s1511_s5 = inlined_call_operand.vmem [shape: f32[8,32], index: 5, kind: input, shape index: {}]   ;;  %s1512_s6 = inlined_call_operand.vmem [shape: f32[8,32], index: 6, kind: input, shape index: {}]   ;;  %s1513_s7 = inlined_call_operand.vmem [shape: f32[64,128], index: 7, kind: output, shape index: {0}]   ;;  %s1514_s8 = inlined_call_operand.vmem [shape: f32[8,32], index: 8, kind: output, shape index: {1}]   ;;  %s1515_s9 = inlined_call_operand.vmem [shape: f32[8,32], index: 9, kind: output, shape index: {2}]  }
   0x1   :  { %s15_s11 = sshll.u32 %s1506_s0, 4  ;;  %s16_s11 = int_to_ptr.vmem [resolvable:$true] %s15_s11 }
   0x2   :  { %s1141_s12 = scalar_lea.vmem %s16_s11, 16  ;;  %p1146_p1 = scmp.lt.s32.totalorder %s16_s11, %s16_s11 }
   0x3   :  { %p1142_p0 = scmp.ne.s32.totalorder %s16_s11, %s1141_s12  ;;  %p1147_p2 = scmp.lt.s32.totalorder %s1141_s12, %s1141_s12 }
   0x5   :  { %p1148_p3 = por %p1147_p2, %p1146_p1 }
   0x7   :  { %p1149_p4 = pnand %p1148_p3, %p1142_p0 }
   0x9   :  { %1152 = shalt.err (!%p1149_p4)  }
   0xa   :  { %s1155_s13 = smov [#allocation5]  }
   0xb   :  { %18 = dma.vmem_to_smem %s16_s11, 16, %s1155_s13, [#allocation4] }
   0xc   :  { %1153 = dma.done.wait [#allocation4], 16 }
   0xd   :  { %1154 = vsyncadd [#allocation4], 4294967280 }
   0xe   :  { %20 = sfence }
   0xf   :  { %v1217_v0 = vld [vmem:[%s1508_s2 + $0x8] sm:$0xff]   ;;  %v1156_v1 = vmov 0.0   ;;  %v1226_v2 = vld [vmem:[%s1508_s2] sm:$0xff]   ;;  %vm1157_vm0 = vmmov 0   ;;  %s41_s19 = sld [smem:[#allocation5]]  ;;  %vm71_vm1 = vcmask 261120  }
  0x10   :  { %1023 = vmatprep.subr.bf16.mxu1 %v1156_v1  ;;  %40 = vst [vmem:[#allocation2] sm:$0xff] %v1156_v1  ;;  %1039 = vmatprep.subr.bf16.mxu0 %v1156_v1  ;;  %v38_v3 = vld [vmem:[%s1511_s5] sm:$0xff]  ;;  %s945_s20 = sld [smem:[#allocation5 + $0x1]]  ;;  %s1158_s12 = smov 64  }
  0x11   :  { %1024 = vmatpush3.bf16.msra.mxu1 %v1217_v0  ;;  %1027 = vmatprep.mubr.msk.bf16.mxu1 %vm1157_vm0, %v1156_v1  ;;  %s946_s21 = sld [smem:[#allocation5 + $0x2]]  ;;  %v58_v4 = vpack.c.bf16 %v38_v3, %v38_v3  ;;  %v39_v16 = vld [vmem:[%s1512_s6] sm:$0xff]  ;;  %s1159_s15 = smov 32  }
  0x12   :  { %1025 = vmatprep.subr.bf16.mxu1 %v1156_v1  ;;  %1040 = vmatpush3.bf16.msra.mxu0 %v1217_v0  ;;  %s947_s2 = sld [smem:[#allocation5 + $0x3]] }
  0x13   :  { %1041 = vmatprep.subr.bf16.mxu0 %v1156_v1  ;;  %1043 = vmatprep.mubr.msk.bf16.mxu0 %vm1157_vm0, %v1156_v1  ;;  %s951_s0 = sld [smem:[#allocation5 + $0x4]] }
  0x14   :  { %s952_s16 = sld [smem:[#allocation5 + $0x5]] }
  0x15   :  { %1026 = vmatpush3.bf16.msra.mxu1 %v1226_v2  ;;  %s42_s23 = scalar_lea.vmem %s1507_s1, %s41_s19  ;;  %s953_s6 = sld [smem:[#allocation5 + $0x6]] }
  0x16   :  { %1031 = vmatprep.subr.bf16.mxu1 %v1156_v1  ;;  %1042 = vmatpush3.bf16.msra.mxu0 %v1226_v2  ;;  %v43_v5 = vld [vmem:[%s42_s23] sm:$0x1]  ;;  %s46_s26 = scalar_lea.vmem %s1507_s1, %s945_s20  ;;  %s954_s17 = sld [smem:[#allocation5 + $0x7]] }
  0x17   :  { %1055 = vmatprep.subr.bf16.mxu0 %v1156_v1  ;;  %44 = vst [vmem:[#allocation2] sm:$0x1] %v43_v5  ;;  %v47_v6 = vld [vmem:[%s46_s26] sm:$0x1]  ;;  %s50_s29 = scalar_lea.vmem %s1507_s1, %s946_s21  ;;  %s956_s28 = sld [smem:[#allocation5 + $0x8]] }
  0x18   :  { %1028 = vmatmul.mubr.msk.bf16.vlgmr.msra.gmra.mxu1 %vm71_vm1, %v58_v4  ;;  %48 = vst [vmem:[#allocation2 + $0x1] sm:$0x1] %v47_v6  ;;  %v51_v7 = vld [vmem:[%s50_s29] sm:$0x1]  ;;  %s54_s11 = scalar_lea.vmem %s1507_s1, %s947_s2  ;;  %s957_s29 = sld [smem:[#allocation5 + $0x9]] }
  0x19   :  { %1032 = vmatpush3.bf16.msra.mxu1 %v1217_v0  ;;  %1035 = vmatprep.mubr.msk.bf16.mxu1 %vm1157_vm0, %v1156_v1  ;;  %52 = vst [vmem:[#allocation2 + $0x2] sm:$0x1] %v51_v7  ;;  %v55_v8 = vld [vmem:[%s54_s11] sm:$0x1]  ;;  %s146_s20 = scalar_lea.vmem %s1507_s1, %s951_s0  ;;  %s958_s30 = sld [smem:[#allocation5 + $0xa]] }
  0x1a   :  { %1033 = vmatprep.subr.bf16.mxu1 %v1156_v1  ;;  %56 = vst [vmem:[#allocation2 + $0x3] sm:$0x1] %v55_v8  ;;  %v147_v26 = vld [vmem:[%s146_s20] sm:$0x1]  ;;  %s150_s5 = scalar_lea.vmem %s1507_s1, %s952_s16  ;;  %s959_s10 = sld [smem:[#allocation5 + $0xb]] }
  0x1b   :  { %v151_v28 = vld [vmem:[%s150_s5] sm:$0x1]  ;;  %s154_s24 = scalar_lea.vmem %s1507_s1, %s953_s6  ;;  %s961_s5 = sld [smem:[#allocation5 + $0xc]] }
  0x1c   :  { %v155_v30 = vld [vmem:[%s154_s24] sm:$0x1]  ;;  %s158_s27 = scalar_lea.vmem %s1507_s1, %s954_s17  ;;  %s962_s22 = sld [smem:[#allocation5 + $0xd]] }
  0x1d   :  { %1034 = vmatpush3.bf16.msra.mxu1 %v1226_v2  ;;  %v159_v31 = vld [vmem:[%s158_s27] sm:$0x1]  ;;  %s236_s14 = scalar_lea.vmem %s1507_s1, %s956_s28  ;;  %s963_s23 = sld [smem:[#allocation5 + $0xe]] }
  0x1e   :  { %1047 = vmatprep.subr.bf16.mxu1 %v1156_v1  ;;  %v237_v49 = vld [vmem:[%s236_s14] sm:$0x1]  ;;  %s240_s6 = scalar_lea.vmem %s1507_s1, %s957_s29  ;;  %s964_s24 = sld [smem:[#allocation5 + $0xf]] }
  0x1f   :  { %v241_v51 = vld [vmem:[%s240_s6] sm:$0x1]  ;;  %s244_s19 = scalar_lea.vmem %s1507_s1, %s958_s30  ;;  %s966_s6 = sld [smem:[#allocation5 + $0x10]] }
  0x20   :  { %v245_v53 = vld [vmem:[%s244_s19] sm:$0x1]  ;;  %s248_s2 = scalar_lea.vmem %s1507_s1, %s959_s10  ;;  %s967_s17 = sld [smem:[#allocation5 + $0x11]] }
  0x21   :  { %v57_v9 = vld [vmem:[#allocation2] sm:$0xff]  ;;  %s326_s27 = scalar_lea.vmem %s1507_s1, %s961_s5  ;;  %s968_s18 = sld [smem:[#allocation5 + $0x12]] }
  0x22   :  { %148 = vst [vmem:[#allocation2] sm:$0x1] %v147_v26  ;;  %152 = vst [vmem:[#allocation2 + $0x1] sm:$0x1] %v151_v28  ;;  %v249_v54 = vld [vmem:[%s248_s2] sm:$0x1]  ;;  %s330_s30 = scalar_lea.vmem %s1507_s1, %s962_s22 }
  0x23   :  { %156 = vst [vmem:[#allocation2 + $0x2] sm:$0x1] %v155_v30  ;;  %160 = vst [vmem:[#allocation2 + $0x3] sm:$0x1] %v159_v31  ;;  %s334_s13 = scalar_lea.vmem %s1507_s1, %s963_s23  ;;  %s969_s19 = sld [smem:[#allocation5 + $0x13]] }
  0x24   :  { %s338_s16 = scalar_lea.vmem %s1507_s1, %s964_s24  ;;  %s972_s10 = sld [smem:[#allocation5 + $0x15]] }
  0x25   :  { %s416_s2 = scalar_lea.vmem %s1507_s1, %s966_s6  ;;  %s973_s11 = sld [smem:[#allocation5 + $0x16]] }
  0x26   :  { %s420_s23 = scalar_lea.vmem %s1507_s1, %s967_s17  ;;  %s977_s24 = sld [smem:[#allocation5 + $0x19]] }
  0x27   :  { %s424_s26 = scalar_lea.vmem %s1507_s1, %s968_s18  ;;  %s978_s25 = sld [smem:[#allocation5 + $0x1a]] }
  0x28   :  { %s983_s20 = sld [smem:[#allocation5 + $0x1e]] }
  0x29   :  { %s428_s29 = scalar_lea.vmem %s1507_s1, %s969_s19  ;;  %s982_s19 = sld [smem:[#allocation5 + $0x1d]] }
  0x2a   :  { %v161_v34 = vld [vmem:[#allocation2] sm:$0xff]  ;;  %s510_s18 = scalar_lea.vmem %s1507_s1, %s972_s10 }
  0x2b   :  { %238 = vst [vmem:[#allocation2] sm:$0x1] %v237_v49  ;;  %242 = vst [vmem:[#allocation2 + $0x1] sm:$0x1] %v241_v51  ;;  %s514_s21 = scalar_lea.vmem %s1507_s1, %s973_s11 }
  0x2c   :  { %246 = vst [vmem:[#allocation2 + $0x2] sm:$0x1] %v245_v53  ;;  %250 = vst [vmem:[#allocation2 + $0x3] sm:$0x1] %v249_v54  ;;  %s600_s11 = scalar_lea.vmem %s1507_s1, %s977_s24 }
  0x2d   :  { %s604_s0 = scalar_lea.vmem %s1507_s1, %s978_s25 }
  0x2e   :  { %s694_s28 = scalar_lea.vmem %s1507_s1, %s983_s20 }
  0x2f   :  { %s690_s25 = scalar_lea.vmem %s1507_s1, %s982_s19 }
  0x33   :  { %v251_v57 = vld [vmem:[#allocation2] sm:$0xff] }
  0xd8   :  { %v109_v10 = vpop.f32.mrf.mxu1 }
  0xd9   :  { %v115_v11 = vadd.f32 %v109_v10, %v57_v9 }
  0xda   :  { %v1029_v12 = vpop.f32.mrf.mxu1 }
  0xdb   :  { %1109 = vtanh.f32 %v115_v11  ;;  %v327_v11 = vld [vmem:[%s326_s27] sm:$0x1] }
  0xdc   :  { %v112_v13 = vpop.f32.mrf.mxu1  ;;  %328 = vst [vmem:[#allocation2] sm:$0x1] %v327_v11 }
  0xdd   :  { %v331_v13 = vld [vmem:[%s330_s30] sm:$0x1]  ;;  %s971_s30 = sld [smem:[#allocation5 + $0x14]] }
  0xde   :  { %v1030_v14 = vpop.f32.mrf.mxu1  ;;  %332 = vst [vmem:[#allocation2 + $0x1] sm:$0x1] %v331_v13 }
  0xe8   :  { %v1110_v15 = vpop.eup %1109 }
  0xe9   :  { %125 = vrot.lane.b32.xlu0 %v1110_v15, %s1158_s12  ;;  %v117_v17 = vmul.f32 0.5, %v1110_v15  ;;  %v335_v15 = vld [vmem:[%s334_s13] sm:$0x1]  ;;  %s974_s13 = sld [smem:[#allocation5 + $0x17]] }
  0xea   :  { %336 = vst [vmem:[#allocation2 + $0x2] sm:$0x1] %v335_v15 }
  0xeb   :  { %v118_v18 = vadd.f32 0.5, %v117_v17 }
  0xed   :  { %120 = vrot.lane.b32.xlu0 %v39_v16, %s1159_s15  ;;  %v339_v16 = vld [vmem:[%s338_s16] sm:$0x1]  ;;  %s506_s16 = scalar_lea.vmem %s1507_s1, %s971_s30 }
  0xee   :  { %340 = vst [vmem:[#allocation2 + $0x3] sm:$0x1] %v339_v16 }
  0xef   :  { %s518_s22 = scalar_lea.vmem %s1507_s1, %s974_s13 }
 0x15b   :  { %v126_v19 = vpop.permute.xlu0 %125 }
 0x15c   :  { %v128_v20 = vmul.f32 %v126_v19, %v118_v18  ;;  %v341_v19 = vld [vmem:[#allocation2] sm:$0xff] }
 0x15e   :  { %130 = vrot.lane.b32.xlu1 %v128_v20, %s1159_s15 }
 0x15f   :  { %v121_v21 = vpop.permute.xlu0 %120 }
 0x160   :  { %v123_v22 = vmul.f32 %v121_v21, %v118_v18 }
 0x1d0   :  { %v131_v23 = vpop.permute.xlu1 %130 }
 0x1d1   :  { %v133_v24 = vadd.f32 %v131_v23, %v123_v22 }
 0x1d3   :  { %1111 = vtanh.f32 %v133_v24 }
 0x1e0   :  { %v1112_v25 = vpop.eup %1111 }
 0x1e1   :  { %136 = vrot.lane.b32.xlu1 %v1112_v25, %s1158_s12 }
 0x253   :  { %v137_v27 = vpop.permute.xlu1 %136 }
 0x254   :  { %v1277_v29 = vmul.f32 %v137_v27, %v118_v18 }
 0x256   :  { %v162_v32 = vpack.c.bf16 %v1277_v29, %v1277_v29 }
 0x258   :  { %164 = vrot.lane.b32.xlu0 %v162_v32, %s1159_s15 }
 0x2ca   :  { %v165_v33 = vpop.permute.xlu0 %164 }
 0x2cb   :  { %1036 = vmatmul.mubr.msk.bf16.vlgmr.msra.gmra.mxu1 %vm71_vm1, %v165_v33 }
 0x2cc   :  { %1048 = vmatpush3.bf16.msra.mxu1 %v1217_v0  ;;  %1051 = vmatprep.mubr.msk.bf16.mxu1 %vm1157_vm0, %v1156_v1 }
 0x2cd   :  { %1049 = vmatprep.subr.bf16.mxu1 %v1156_v1 }
 0x2d0   :  { %1050 = vmatpush3.bf16.msra.mxu1 %v1226_v2 }
 0x2d1   :  { %1063 = vmatprep.subr.bf16.mxu1 %v1156_v1 }
 0x38b   :  { %v203_v35 = vpop.f32.mrf.mxu1 }
 0x38c   :  { %v209_v36 = vadd.f32 %v203_v35, %v161_v34  ;;  %v417_v35 = vld [vmem:[%s416_s2] sm:$0x1] }
 0x38d   :  { %v1037_v37 = vpop.f32.mrf.mxu1  ;;  %418 = vst [vmem:[#allocation2] sm:$0x1] %v417_v35 }
 0x38e   :  { %1113 = vtanh.f32 %v209_v36  ;;  %v421_v37 = vld [vmem:[%s420_s23] sm:$0x1]  ;;  %s976_s23 = sld [smem:[#allocation5 + $0x18]] }
 0x38f   :  { %v206_v38 = vpop.f32.mrf.mxu1  ;;  %422 = vst [vmem:[#allocation2 + $0x1] sm:$0x1] %v421_v37 }
 0x391   :  { %v1038_v39 = vpop.f32.mrf.mxu1 }
 0x392   :  { %v425_v39 = vld [vmem:[%s424_s26] sm:$0x1]  ;;  %s979_s26 = sld [smem:[#allocation5 + $0x1b]] }
 0x393   :  { %426 = vst [vmem:[#allocation2 + $0x2] sm:$0x1] %v425_v39 }
 0x398   :  { %s608_s17 = scalar_lea.vmem %s1507_s1, %s979_s26 }
 0x39b   :  { %v1114_v40 = vpop.eup %1113 }
 0x39c   :  { %215 = vrot.lane.b32.xlu1 %v1114_v40, %s1158_s12  ;;  %v211_v41 = vmul.f32 0.5, %v1114_v40  ;;  %v429_v40 = vld [vmem:[%s428_s29] sm:$0x1]  ;;  %s596_s29 = scalar_lea.vmem %s1507_s1, %s976_s23 }
 0x39d   :  { %430 = vst [vmem:[#allocation2 + $0x3] sm:$0x1] %v429_v40 }
 0x39e   :  { %v212_v42 = vadd.f32 0.5, %v211_v41 }
 0x3a0   :  { %v213_v45 = vmul.f32 %v212_v42, %v133_v24 }
 0x40e   :  { %v216_v43 = vpop.permute.xlu1 %215 }
 0x40f   :  { %v218_v44 = vmul.f32 %v216_v43, %v212_v42  ;;  %v431_v43 = vld [vmem:[#allocation2] sm:$0xff] }
 0x411   :  { %220 = vrot.lane.b32.xlu0 %v218_v44, %s1159_s15 }
 0x483   :  { %v221_v46 = vpop.permute.xlu0 %220 }
 0x484   :  { %v223_v47 = vadd.f32 %v221_v46, %v213_v45 }
 0x486   :  { %1115 = vtanh.f32 %v223_v47 }
 0x493   :  { %v1116_v48 = vpop.eup %1115 }
 0x494   :  { %226 = vrot.lane.b32.xlu1 %v1116_v48, %s1158_s12 }
 0x506   :  { %v227_v50 = vpop.permute.xlu1 %226 }
 0x507   :  { %v1304_v52 = vmul.f32 %v227_v50, %v212_v42 }
 0x509   :  { %v252_v55 = vpack.c.bf16 %v1304_v52, %v1304_v52 }
 0x50b   :  { %254 = vrot.lane.b32.xlu0 %v252_v55, %s1159_s15 }
 0x57d   :  { %v255_v56 = vpop.permute.xlu0 %254 }
 0x57e   :  { %1044 = vmatmul.mubr.msk.bf16.vlgmr.msra.gmra.mxu0 %vm71_vm1, %v255_v56 }
 0x57f   :  { %1056 = vmatpush3.bf16.msra.mxu0 %v1217_v0  ;;  %1059 = vmatprep.mubr.msk.bf16.mxu0 %vm1157_vm0, %v1156_v1 }
 0x580   :  { %1057 = vmatprep.subr.bf16.mxu0 %v1156_v1 }
 0x583   :  { %1058 = vmatpush3.bf16.msra.mxu0 %v1226_v2 }
 0x584   :  { %1071 = vmatprep.subr.bf16.mxu0 %v1156_v1 }
 0x63e   :  { %v293_v58 = vpop.f32.mrf.mxu0 }
 0x63f   :  { %v299_v59 = vadd.f32 %v293_v58, %v251_v57 }
 0x640   :  { %v1045_v60 = vpop.f32.mrf.mxu0 }
 0x641   :  { %1117 = vtanh.f32 %v299_v59  ;;  %v507_v59 = vld [vmem:[%s506_s16] sm:$0x1] }
 0x642   :  { %v296_v61 = vpop.f32.mrf.mxu0  ;;  %508 = vst [vmem:[#allocation2] sm:$0x1] %v507_v59 }
 0x643   :  { %v511_v61 = vld [vmem:[%s510_s18] sm:$0x1]  ;;  %s981_s18 = sld [smem:[#allocation5 + $0x1c]] }
 0x644   :  { %v1046_v62 = vpop.f32.mrf.mxu0  ;;  %512 = vst [vmem:[#allocation2 + $0x1] sm:$0x1] %v511_v61 }
 0x64e   :  { %v1118_v63 = vpop.eup %1117 }
 0x64f   :  { %305 = vrot.lane.b32.xlu1 %v1118_v63, %s1158_s12  ;;  %v301_v3 = vmul.f32 0.5, %v1118_v63  ;;  %v515_v63 = vld [vmem:[%s514_s21] sm:$0x1]  ;;  %s984_s21 = sld [smem:[#allocation5 + $0x1f]] }
 0x650   :  { %516 = vst [vmem:[#allocation2 + $0x2] sm:$0x1] %v515_v63 }
 0x651   :  { %v302_v4 = vadd.f32 0.5, %v301_v3  ;;  %v519_v3 = vld [vmem:[%s518_s22] sm:$0x1]  ;;  %s686_s22 = scalar_lea.vmem %s1507_s1, %s981_s18 }
 0x652   :  { %520 = vst [vmem:[#allocation2 + $0x3] sm:$0x1] %v519_v3 }
 0x653   :  { %v303_v7 = vmul.f32 %v302_v4, %v223_v47 }
 0x655   :  { %s698_s10 = scalar_lea.vmem %s1507_s1, %s984_s21  ;;  %s1160_s1 = smov 96  }
 0x6c1   :  { %v306_v5 = vpop.permute.xlu1 %305 }
 0x6c2   :  { %v308_v6 = vmul.f32 %v306_v5, %v302_v4 }
 0x6c4   :  { %310 = vrot.lane.b32.xlu0 %v308_v6, %s1159_s15  ;;  %v521_v6 = vld [vmem:[#allocation2] sm:$0xff] }
 0x736   :  { %v311_v8 = vpop.permute.xlu0 %310 }
 0x737   :  { %v313_v9 = vadd.f32 %v311_v8, %v303_v7 }
 0x739   :  { %1119 = vtanh.f32 %v313_v9 }
 0x746   :  { %v1120_v10 = vpop.eup %1119 }
 0x747   :  { %316 = vrot.lane.b32.xlu1 %v1120_v10, %s1158_s12 }
 0x7b9   :  { %v317_v12 = vpop.permute.xlu1 %316 }
 0x7ba   :  { %v1331_v14 = vmul.f32 %v317_v12, %v302_v4 }
 0x7bc   :  { %v342_v17 = vpack.c.bf16 %v1331_v14, %v1331_v14 }
 0x7be   :  { %344 = vrot.lane.b32.xlu0 %v342_v17, %s1159_s15 }
 0x830   :  { %v345_v18 = vpop.permute.xlu0 %344 }
 0x831   :  { %1052 = vmatmul.mubr.msk.bf16.vlgmr.msra.gmra.mxu1 %vm71_vm1, %v345_v18 }
 0x832   :  { %1064 = vmatpush3.bf16.msra.mxu1 %v1217_v0  ;;  %1067 = vmatprep.mubr.msk.bf16.mxu1 %vm1157_vm0, %v1156_v1 }
 0x833   :  { %1065 = vmatprep.subr.bf16.mxu1 %v1156_v1 }
 0x836   :  { %1066 = vmatpush3.bf16.msra.mxu1 %v1226_v2 }
 0x837   :  { %1079 = vmatprep.subr.bf16.mxu1 %v1156_v1 }
 0x8f1   :  { %v383_v20 = vpop.f32.mrf.mxu1 }
 0x8f2   :  { %v389_v21 = vadd.f32 %v383_v20, %v341_v19  ;;  %v597_v19 = vld [vmem:[%s596_s29] sm:$0x1] }
 0x8f3   :  { %v1053_v22 = vpop.f32.mrf.mxu1  ;;  %598 = vst [vmem:[#allocation2] sm:$0x1] %v597_v19 }
 0x8f4   :  { %1121 = vtanh.f32 %v389_v21  ;;  %v601_v21 = vld [vmem:[%s600_s11] sm:$0x1] }
 0x8f5   :  { %v386_v23 = vpop.f32.mrf.mxu1  ;;  %602 = vst [vmem:[#allocation2 + $0x1] sm:$0x1] %v601_v21 }
 0x8f6   :  { %v605_v23 = vld [vmem:[%s604_s0] sm:$0x1] }
 0x8f7   :  { %v1054_v24 = vpop.f32.mrf.mxu1  ;;  %606 = vst [vmem:[#allocation2 + $0x2] sm:$0x1] %v605_v23 }
 0x8f8   :  { %v609_v24 = vld [vmem:[%s608_s17] sm:$0x1] }
 0x8f9   :  { %610 = vst [vmem:[#allocation2 + $0x3] sm:$0x1] %v609_v24 }
 0x901   :  { %v1122_v25 = vpop.eup %1121 }
 0x902   :  { %395 = vrot.lane.b32.xlu1 %v1122_v25, %s1158_s12  ;;  %v391_v26 = vmul.f32 0.5, %v1122_v25 }
 0x904   :  { %v392_v27 = vadd.f32 0.5, %v391_v26 }
 0x906   :  { %v393_v31 = vmul.f32 %v392_v27, %v313_v9 }
 0x974   :  { %v396_v28 = vpop.permute.xlu1 %395 }
 0x975   :  { %v398_v30 = vmul.f32 %v396_v28, %v392_v27  ;;  %v687_v28 = vld [vmem:[%s686_s22] sm:$0x1] }
 0x977   :  { %400 = vrot.lane.b32.xlu0 %v398_v30, %s1159_s15  ;;  %v691_v30 = vld [vmem:[%s690_s25] sm:$0x1] }
 0x9e9   :  { %v401_v32 = vpop.permute.xlu0 %400 }
 0x9ea   :  { %v403_v33 = vadd.f32 %v401_v32, %v393_v31  ;;  %v695_v31 = vld [vmem:[%s694_s28] sm:$0x1] }
 0x9eb   :  { %v699_v32 = vld [vmem:[%s698_s10] sm:$0x1] }
 0x9ec   :  { %1123 = vtanh.f32 %v403_v33 }
 0x9f9   :  { %v1124_v34 = vpop.eup %1123 }
 0x9fa   :  { %406 = vrot.lane.b32.xlu1 %v1124_v34, %s1158_s12 }
 0xa6c   :  { %v407_v36 = vpop.permute.xlu1 %406 }
 0xa6d   :  { %v1358_v38 = vmul.f32 %v407_v36, %v392_v27  ;;  %v611_v27 = vld [vmem:[#allocation2] sm:$0xff] }
 0xa6e   :  { %688 = vst [vmem:[#allocation2] sm:$0x1] %v687_v28  ;;  %692 = vst [vmem:[#allocation2 + $0x1] sm:$0x1] %v691_v30 }
 0xa6f   :  { %v432_v41 = vpack.c.bf16 %v1358_v38, %v1358_v38  ;;  %696 = vst [vmem:[#allocation2 + $0x2] sm:$0x1] %v695_v31  ;;  %700 = vst [vmem:[#allocation2 + $0x3] sm:$0x1] %v699_v32 }
 0xa71   :  { %434 = vrot.lane.b32.xlu0 %v432_v41, %s1159_s15 }
 0xae3   :  { %v435_v42 = vpop.permute.xlu0 %434 }
 0xae4   :  { %1060 = vmatmul.mubr.msk.bf16.vlgmr.msra.gmra.mxu0 %vm71_vm1, %v435_v42 }
 0xae5   :  { %1072 = vmatpush3.bf16.msra.mxu0 %v1217_v0  ;;  %1075 = vmatprep.mubr.msk.bf16.mxu0 %vm1157_vm0, %v1156_v1 }
 0xae6   :  { %1073 = vmatprep.subr.bf16.mxu0 %v1156_v1 }
 0xae9   :  { %1074 = vmatpush3.bf16.msra.mxu0 %v1226_v2 }
 0xba4   :  { %v473_v44 = vpop.f32.mrf.mxu0 }
 0xba5   :  { %v479_v45 = vadd.f32 %v473_v44, %v431_v43 }
 0xba6   :  { %v1061_v46 = vpop.f32.mrf.mxu0 }
 0xba7   :  { %1125 = vtanh.f32 %v479_v45 }
 0xba8   :  { %v476_v47 = vpop.f32.mrf.mxu0 }
 0xbaa   :  { %v1062_v48 = vpop.f32.mrf.mxu0 }
 0xbb4   :  { %v1126_v49 = vpop.eup %1125 }
 0xbb5   :  { %485 = vrot.lane.b32.xlu1 %v1126_v49, %s1158_s12  ;;  %v481_v50 = vmul.f32 0.5, %v1126_v49 }
 0xbb7   :  { %v482_v51 = vadd.f32 0.5, %v481_v50 }
 0xbb9   :  { %v483_v55 = vmul.f32 %v482_v51, %v403_v33 }
 0xc27   :  { %v486_v53 = vpop.permute.xlu1 %485 }
 0xc28   :  { %v488_v54 = vmul.f32 %v486_v53, %v482_v51  ;;  %v701_v53 = vld [vmem:[#allocation2] sm:$0xff] }
 0xc2a   :  { %490 = vrot.lane.b32.xlu0 %v488_v54, %s1159_s15 }
 0xc9c   :  { %v491_v56 = vpop.permute.xlu0 %490 }
 0xc9d   :  { %v493_v57 = vadd.f32 %v491_v56, %v483_v55 }
 0xc9f   :  { %1127 = vtanh.f32 %v493_v57 }
 0xcac   :  { %v1128_v58 = vpop.eup %1127 }
 0xcad   :  { %496 = vrot.lane.b32.xlu1 %v1128_v58, %s1158_s12 }
 0xd1f   :  { %v497_v60 = vpop.permute.xlu1 %496 }
 0xd20   :  { %v1384_v62 = vmul.f32 %v497_v60, %v482_v51 }
 0xd22   :  { %v522_v4 = vpack.c.bf16 %v1384_v62, %v1384_v62 }
 0xd24   :  { %524 = vrot.lane.b32.xlu0 %v522_v4, %s1159_s15 }
 0xd96   :  { %v525_v5 = vpop.permute.xlu0 %524 }
 0xd97   :  { %1068 = vmatmul.mubr.msk.bf16.vlgmr.msra.gmra.mxu1 %vm71_vm1, %v525_v5 }
 0xd98   :  { %1080 = vmatpush3.bf16.msra.mxu1 %v1217_v0  ;;  %1083 = vmatprep.mubr.msk.bf16.mxu1 %vm1157_vm0, %v1156_v1 }
 0xd99   :  { %1081 = vmatprep.subr.bf16.mxu1 %v1156_v1 }
 0xd9c   :  { %1082 = vmatpush3.bf16.msra.mxu1 %v1226_v2 }
 0xe57   :  { %v563_v7 = vpop.f32.mrf.mxu1 }
 0xe58   :  { %v569_v8 = vadd.f32 %v563_v7, %v521_v6 }
 0xe59   :  { %v1069_v9 = vpop.f32.mrf.mxu1 }
 0xe5a   :  { %1129 = vtanh.f32 %v569_v8 }
 0xe5b   :  { %v566_v10 = vpop.f32.mrf.mxu1 }
 0xe5c   :  { %v1108_v10 = vld [vmem:[%s1509_s3] sm:$0xff]  }
 0xe5d   :  { %v1070_v11 = vpop.f32.mrf.mxu1 }
 0xe67   :  { %v1130_v12 = vpop.eup %1129 }
 0xe68   :  { %575 = vrot.lane.b32.xlu1 %v1130_v12, %s1158_s12  ;;  %v571_v13 = vmul.f32 0.5, %v1130_v12 }
 0xe6a   :  { %v572_v15 = vadd.f32 0.5, %v571_v13 }
 0xe6c   :  { %v573_v17 = vmul.f32 %v572_v15, %v493_v57 }
 0xeda   :  { %v576_v0 = vpop.permute.xlu1 %575 }
 0xedb   :  { %v578_v16 = vmul.f32 %v576_v0, %v572_v15 }
 0xedd   :  { %580 = vrot.lane.b32.xlu0 %v578_v16, %s1159_s15 }
 0xf4f   :  { %v581_v1 = vpop.permute.xlu0 %580 }
 0xf50   :  { %v583_v18 = vadd.f32 %v581_v1, %v573_v17 }
 0xf52   :  { %1131 = vtanh.f32 %v583_v18 }
 0xf5f   :  { %v1132_v2 = vpop.eup %1131 }
 0xf60   :  { %586 = vrot.lane.b32.xlu1 %v1132_v2, %s1158_s12 }
 0xfd2   :  { %v587_v20 = vpop.permute.xlu1 %586 }
 0xfd3   :  { %v1410_v22 = vmul.f32 %v587_v20, %v572_v15 }
 0xfd5   :  { %v612_v25 = vpack.c.bf16 %v1410_v22, %v1410_v22 }
 0xfd7   :  { %614 = vrot.lane.b32.xlu0 %v612_v25, %s1159_s15 }
0x1049   :  { %v615_v26 = vpop.permute.xlu0 %614 }
0x104a   :  { %1076 = vmatmul.mubr.msk.bf16.vlgmr.msra.gmra.mxu0 %vm71_vm1, %v615_v26  ;;  %v986_v26 = vld [vmem:[%s1510_s4] ss:$0 sm:$0xff] }
0x110a   :  { %v653_v33 = vpop.f32.mrf.mxu0 }
0x110b   :  { %v659_v34 = vadd.f32 %v653_v33, %v611_v27 }
0x110c   :  { %v1077_v35 = vpop.f32.mrf.mxu0 }
0x110d   :  { %1133 = vtanh.f32 %v659_v34 }
0x110e   :  { %v656_v36 = vpop.f32.mrf.mxu0 }
0x1110   :  { %v1078_v37 = vpop.f32.mrf.mxu0 }
0x111a   :  { %v1134_v39 = vpop.eup %1133 }
0x111b   :  { %665 = vrot.lane.b32.xlu1 %v1134_v39, %s1158_s12  ;;  %v661_v40 = vmul.f32 0.5, %v1134_v39 }
0x111d   :  { %v662_v41 = vadd.f32 0.5, %v661_v40 }
0x111f   :  { %v663_v44 = vmul.f32 %v662_v41, %v583_v18 }
0x118d   :  { %v666_v42 = vpop.permute.xlu1 %665 }
0x118e   :  { %v668_v43 = vmul.f32 %v666_v42, %v662_v41 }
0x1190   :  { %670 = vrot.lane.b32.xlu0 %v668_v43, %s1159_s15 }
0x1202   :  { %v671_v45 = vpop.permute.xlu0 %670 }
0x1203   :  { %v673_v46 = vadd.f32 %v671_v45, %v663_v44 }
0x1205   :  { %1135 = vtanh.f32 %v673_v46 }
0x1212   :  { %v1136_v47 = vpop.eup %1135 }
0x1213   :  { %676 = vrot.lane.b32.xlu1 %v1136_v47, %s1158_s12 }
0x1285   :  { %v677_v48 = vpop.permute.xlu1 %676 }
0x1286   :  { %v679_v49 = vmul.f32 %v677_v48, %v662_v41 }
0x1288   :  { %v702_v50 = vpack.c.bf16 %v679_v49, %v679_v49 }
0x128a   :  { %704 = vrot.lane.b32.xlu0 %v702_v50, %s1159_s15 }
0x12fc   :  { %v705_v51 = vpop.permute.xlu0 %704 }
0x12fd   :  { %1084 = vmatmul.mubr.msk.bf16.vlgmr.msra.gmra.mxu1 %vm71_vm1, %v705_v51 }
0x13bd   :  { %v743_v54 = vpop.f32.mrf.mxu1 }
0x13be   :  { %v749_v55 = vadd.f32 %v743_v54, %v701_v53 }
0x13bf   :  { %v1085_v56 = vpop.f32.mrf.mxu1 }
0x13c0   :  { %1137 = vtanh.f32 %v749_v55 }
0x13c1   :  { %v746_v57 = vpop.f32.mrf.mxu1 }
0x13c3   :  { %v1086_v58 = vpop.f32.mrf.mxu1 }
0x13cd   :  { %v1138_v59 = vpop.eup %1137 }
0x13ce   :  { %755 = vrot.lane.b32.xlu1 %v1138_v59, %s1158_s12  ;;  %v751_v60 = vmul.f32 0.5, %v1138_v59 }
0x13d0   :  { %v752_v61 = vadd.f32 0.5, %v751_v60 }
0x13d2   :  { %v753_v4 = vmul.f32 %v752_v61, %v673_v46 }
0x1440   :  { %v756_v63 = vpop.permute.xlu1 %755 }
0x1441   :  { %v758_v3 = vmul.f32 %v756_v63, %v752_v61 }
0x1443   :  { %760 = vrot.lane.b32.xlu0 %v758_v3, %s1159_s15 }
0x1447   :  { %141 = vrot.lane.b32.xlu0 %v1277_v29, %s1159_s15 }
0x144b   :  { %321 = vrot.lane.b32.xlu0 %v1331_v14, %s1159_s15  ;;  %v1107_v14 = vld [vmem:[%s1509_s3 + $0x8] sm:$0xff]  }
0x144c   :  { %1087 = vmatprep.subr.bf16.mxu0 %v1107_v14 }
0x144d   :  { %1088 = vmatpush3.bf16.msra.mxu0 %v1107_v14 }
0x144e   :  { %1089 = vmatprep.subr.bf16.mxu0 %v1108_v10 }
0x144f   :  { %501 = vrot.lane.b32.xlu0 %v1384_v62, %s1159_s15 }
0x1451   :  { %1090 = vmatpush3.bf16.msra.mxu0 %v1108_v10 }
0x1453   :  { %681 = vrot.lane.b32.xlu0 %v679_v49, %s1159_s15 }
0x14b5   :  { %v761_v5 = vpop.permute.xlu0 %760 }
0x14b6   :  { %v763_v6 = vadd.f32 %v761_v5, %v753_v4 }
0x14b8   :  { %1139 = vtanh.f32 %v763_v6  ;;  %777 = vrot.lane.b32.xlu0 %v763_v6, %s1160_s1 }
0x14b9   :  { %v142_v7 = vpop.permute.xlu0 %141 }
0x14ba   :  { %144 = vst.msk [vmem:[#allocation3] sm:$0xff] %vm71_vm1, %v142_v7 }
0x14bd   :  { %v322_v8 = vpop.permute.xlu0 %321 }
0x14be   :  { %324 = vst.msk [vmem:[#allocation3 + $0x10] sm:$0xff] %vm71_vm1, %v322_v8 }
0x14c1   :  { %v502_v29 = vpop.permute.xlu0 %501  ;;  %v781_v0 = vld [vmem:[#allocation3] sm:$0xff] }
0x14c2   :  { %504 = vst.msk [vmem:[#allocation3 + $0x20] sm:$0xff] %vm71_vm1, %v502_v29 }
0x14c5   :  { %v1140_v62 = vpop.eup %1139  ;;  %v682_v9 = vpop.permute.xlu0 %681  ;;  %v783_v1 = vld [vmem:[#allocation3 + $0x10] sm:$0xff] }
0x14c6   :  { %684 = vst.msk [vmem:[#allocation3 + $0x30] sm:$0xff] %vm71_vm1, %v682_v9  ;;  %766 = vrot.lane.b32.xlu1 %v1140_v62, %s1158_s12 }
0x14c9   :  { %v785_v19 = vld [vmem:[#allocation3 + $0x20] sm:$0xff] }
0x14ca   :  { %231 = vrot.lane.b32.xlu1 %v1304_v52, %s1159_s15 }
0x14cd   :  { %v787_v23 = vld [vmem:[#allocation3 + $0x30] sm:$0xff] }
0x14ce   :  { %411 = vrot.lane.b32.xlu1 %v1358_v38, %s1159_s15 }
0x14d2   :  { %591 = vrot.lane.b32.xlu1 %v1410_v22, %s1159_s15 }
0x152a   :  { %v778_v11 = vpop.permute.xlu0 %777 }
0x152b   :  { %780 = vst.msk [vmem:[%s1515_s9] sm:$0xff] %vm71_vm1, %v778_v11 }
0x1538   :  { %v767_v12 = vpop.permute.xlu1 %766 }
0x1539   :  { %v769_v13 = vmul.f32 %v767_v12, %v752_v61 }
0x153b   :  { %771 = vrot.lane.b32.xlu1 %v769_v13, %s1159_s15 }
0x153c   :  { %v232_v15 = vpop.permute.xlu1 %231 }
0x153d   :  { %234 = vst.msk [vmem:[#allocation3 + $0x8] sm:$0xff] %vm71_vm1, %v232_v15 }
0x1540   :  { %v412_v52 = vpop.permute.xlu1 %411 }
0x1541   :  { %414 = vst.msk [vmem:[#allocation3 + $0x18] sm:$0xff] %vm71_vm1, %v412_v52 }
0x1544   :  { %v592_v38 = vpop.permute.xlu1 %591  ;;  %v782_v16 = vld [vmem:[#allocation3 + $0x8] sm:$0xff] }
0x1545   :  { %594 = vst.msk [vmem:[#allocation3 + $0x28] sm:$0xff] %vm71_vm1, %v592_v38  ;;  %v789_v17 = vpack.c.bf16 %v782_v16, %v781_v0 }
0x1547   :  { %1091 = vmatprep.mubr.msk.bf16.mxu0 %vm71_vm1, %v789_v17 }
0x1548   :  { %v784_v18 = vld [vmem:[#allocation3 + $0x18] sm:$0xff] }
0x1549   :  { %v790_v2 = vpack.c.bf16 %v784_v18, %v783_v1 }
0x154b   :  { %1092 = vmatmul.mubr.msk.bf16.vlgmr.msra.gmra.mxu0 %vm71_vm1, %v790_v2 }
0x154c   :  { %v786_v20 = vld [vmem:[#allocation3 + $0x28] sm:$0xff] }
0x154d   :  { %v791_v21 = vpack.c.bf16 %v786_v20, %v785_v19 }
0x154f   :  { %1095 = vmatprep.mubr.msk.bf16.mxu0 %vm71_vm1, %v791_v21 }
0x15ad   :  { %v772_v22 = vpop.permute.xlu1 %771 }
0x15ae   :  { %774 = vst.msk [vmem:[#allocation3 + $0x38] sm:$0xff] %vm71_vm1, %v772_v22  ;;  %775 = vst.msk [vmem:[%s1514_s8] sm:$0xff] %vm71_vm1, %v772_v22 }
0x15b5   :  { %v788_v24 = vld [vmem:[#allocation3 + $0x38] sm:$0xff] }
0x15b6   :  { %v792_v25 = vpack.c.bf16 %v788_v24, %v787_v23 }
0x15b8   :  { %1096 = vmatmul.mubr.msk.bf16.gmra.mxu0 %vm71_vm1, %v792_v25 }
0x160b   :  { %v1093_v27 = vpop.f32.mrf.mxu0 }
0x160c   :  { %v871_v28 = vadd.f32 %v1093_v27, %v986_v26 }
0x160d   :  { %v862_v30 = vpop.f32.mrf.mxu0 }
0x160e   :  { %895 = vst [vmem:[%s1513_s7 + $0x10] sm:$0xff] %v871_v28  ;;  %v863_v31 = vadd.f32 %v986_v26, %v862_v30 }
0x160f   :  { %v1094_v32 = vpop.f32.mrf.mxu0 }
0x1610   :  { %893 = vst [vmem:[%s1513_s7] sm:$0xff] %v863_v31  ;;  %v874_v33 = vadd.f32 %v1094_v32, %v986_v26 }
0x1611   :  { %v865_v34 = vpop.f32.mrf.mxu0 }
0x1612   :  { %896 = vst [vmem:[%s1513_s7 + $0x18] sm:$0xff] %v874_v33  ;;  %v866_v35 = vadd.f32 %v986_v26, %v865_v34 }
0x1614   :  { %894 = vst [vmem:[%s1513_s7 + $0x8] sm:$0xff] %v866_v35 }
0x1678   :  { %v1097_v36 = vpop.f32.mrf.mxu0 }
0x1679   :  { %v887_v37 = vadd.f32 %v1097_v36, %v986_v26 }
0x167a   :  { %v878_v39 = vpop.f32.mrf.mxu0 }
0x167b   :  { %899 = vst [vmem:[%s1513_s7 + $0x30] sm:$0xff] %v887_v37  ;;  %v879_v40 = vadd.f32 %v986_v26, %v878_v39 }
0x167c   :  { %v1098_v41 = vpop.f32.mrf.mxu0 }
0x167d   :  { %897 = vst [vmem:[%s1513_s7 + $0x20] sm:$0xff] %v879_v40  ;;  %v890_v42 = vadd.f32 %v1098_v41, %v986_v26 }
0x167e   :  { %v881_v43 = vpop.f32.mrf.mxu0 }
0x167f   :  { %900 = vst [vmem:[%s1513_s7 + $0x38] sm:$0xff] %v890_v42  ;;  %v882_v44 = vadd.f32 %v986_v26, %v881_v43 }
0x1681   :  { %898 = vst [vmem:[%s1513_s7 + $0x28] sm:$0xff] %v882_v44 }

</bundles_post_ra>
